<compile_context>
chip_gen: v7x
topology: tpu7x:2x2x1
jax: 0.10.0
libtpu: 0.0.40
codegen_flags: <defaults>
</compile_context>

<pallas_src>
import functools

import jax
import jax.numpy as jnp
import numpy as np
from jax.experimental import pallas as pl
from jax.experimental.pallas import tpu as pltpu


# ----------------------------------------------------------------------------
# Plain-JAX glue: PyTorch-style bilinear interpolation (align_corners=False).
# Pure parameter preprocessing - done once outside the kernel.
# ----------------------------------------------------------------------------
def bilinear_resize(img, out_h, out_w):
    in_h, in_w = img.shape
    sy = in_h / out_h
    sx = in_w / out_w
    ys = jnp.maximum((jnp.arange(out_h, dtype=jnp.float32) + 0.5) * sy - 0.5, 0.0)
    xs = jnp.maximum((jnp.arange(out_w, dtype=jnp.float32) + 0.5) * sx - 0.5, 0.0)
    y0 = jnp.floor(ys).astype(jnp.int32)
    x0 = jnp.floor(xs).astype(jnp.int32)
    y1 = jnp.minimum(y0 + 1, in_h - 1)
    x1 = jnp.minimum(x0 + 1, in_w - 1)
    wy = ys - y0.astype(jnp.float32)
    wx = xs - x0.astype(jnp.float32)
    ia = img[y0][:, x0]
    ib = img[y0][:, x1]
    ic = img[y1][:, x0]
    id_ = img[y1][:, x1]
    top = ia * (1.0 - wx)[None, :] + ib * wx[None, :]
    bot = ic * (1.0 - wx)[None, :] + id_ * wx[None, :]
    return top * (1.0 - wy)[:, None] + bot * wy[:, None]


# ----------------------------------------------------------------------------
# Pallas kernel: one grid step = `block_b` batch elements, fully fused.
# ----------------------------------------------------------------------------
def _qselection_kernel(x_ref, prior_ref, w1t_ref, b1_ref, w2t_ref, b2_ref,
                       o_ref, m_scr, *, eps, dense_epilogue):
    block_b = x_ref.shape[0]
    hw = x_ref.shape[-1]
    inv_hw = 1.0 / hw

    # ---- pooled per-(batch, channel) statistics, single pass over the tile.
    # Serves both the GAP input of the MLP and the InstanceNorm statistics.
    xs = x_ref[...].astype(jnp.float32)                      # [Bt, C, HW]
    mean = jnp.sum(xs, axis=-1) * inv_hw                     # [Bt, C]  (C on lanes)
    var = jnp.sum(xs * xs, axis=-1) * inv_hw - mean * mean   # biased (InstanceNorm)
    var = jnp.maximum(var, 0.0)                              # guard vs. cancellation

    # ---- channel-attention MLP, lane-major.  BatchNorm (eval) is folded into
    # w1t/b1 and 1/tau into w2t/b2 by the wrapper.
    h = jnp.dot(mean, w1t_ref[...],
                preferred_element_type=jnp.float32) + b1_ref[...]       # [Bt, Ch]
    h = jnp.maximum(h, 0.0)                                             # ReLU
    logits = jnp.dot(h, w2t_ref[...],
                     preferred_element_type=jnp.float32) + b2_ref[...]  # [Bt, C]

    # softmax over channels (lane axis)
    z = logits - jnp.max(logits, axis=-1, keepdims=True)
    ez = jnp.exp(z)
    ex = ez / jnp.sum(ez, axis=-1, keepdims=True)            # [Bt, C]

    # ---- InstanceNorm + channel-weighted sum fused:
    #   m_bp = sum_c ex_bc (x_bcp - mean_bc) * rsqrt(var_bc + eps)
    #        = sum_c a_bc x_bcp - s_b
    a = ex * jax.lax.rsqrt(var + eps)                        # [Bt, C]
    s = jnp.sum(a * mean, axis=-1, keepdims=True)            # [Bt, 1]

    prior = prior_ref[...]                                   # [1, HW]
    if dense_epilogue:
        # Dense [Bt, HW] epilogue: weighted channel (sublane) reduction, one
        # full-vreg sigmoid, one lane/sublane-dense store.  Re-read x from the
        # ref so the compiler can bound live ranges at large block_b.
        xe = x_ref[...].astype(jnp.float32)                  # [Bt, C, HW]
        m = jnp.sum(xe * a[:, :, None], axis=1) - s          # [Bt, HW]
        o_ref[...] = jax.nn.sigmoid(m * prior)
    else:
        # Fallback variant (known-good lowering): per-row MXU dot into a VMEM
        # scratch, then one dense sigmoid + one dense HBM store.
        for b in range(block_b):
            xb = x_ref[b].astype(jnp.float32)                # [C, HW]
            m_scr[b:b + 1, :] = jnp.dot(a[b:b + 1, :], xb,
                                        preferred_element_type=jnp.float32)
        o_ref[...] = jax.nn.sigmoid((m_scr[...] - s) * prior)


# ----------------------------------------------------------------------------
# Wrapper: parameter folding, block sizing, pallas_call.
# ----------------------------------------------------------------------------
def qselection_forward(x, params, tau_channel=1.0, prior_resized=None,
                       block_b=None):
    """x: [B, C, H, W] float32 or bfloat16 (NCHW).  Returns [B, 1, H, W] f32."""
    B, C, H, W = x.shape
    HW = H * W
    Ch = params["w1"].shape[0]
    eps = 1e-5  # PyTorch default for both InstanceNorm2d and BatchNorm2d

    # -- fold BatchNorm (eval mode) into conv1 and 1/tau into conv2; weights
    #    are pre-transposed for the lane-major in-kernel matmuls.
    bn_scale = params["bn_gamma"] * jax.lax.rsqrt(params["bn_rv"] + eps)   # [Ch]
    w1t = (params["w1"] * bn_scale[:, None]).T                             # [C, Ch]
    b1 = (params["b1"] * bn_scale + params["bn_beta"]
          - params["bn_rm"] * bn_scale)[None, :]                           # [1, Ch]
    inv_tau = 1.0 / float(tau_channel)
    w2t = (params["w2"] * inv_tau).T                                       # [Ch, C]
    b2 = (params["b2"] * inv_tau)[None, :]                                 # [1, C]

    # -- resized prior: pass it in precomputed (cached per H, W) if possible.
    if prior_resized is None:
        prior_resized = bilinear_resize(params["prior"][0, 0], H, W)
    prior_row = prior_resized.reshape(1, HW).astype(jnp.float32)

    x_flat = x.reshape(B, C, HW)        # keep caller dtype (f32 or bf16 stream)

    # -- generation-aware sizing: physical VMEM drives the batch sub-block
    #    size and the scoped-VMEM limit (v5e/v6e 128 MiB, v7x 64 MiB).
    try:
        phys_vmem = int(pltpu.get_tpu_info().vmem_capacity_bytes)
    except Exception:
        phys_vmem = 64 << 20            # conservative fallback (v7x per-core)

    ceil_div = lambda a, b: -(-a // b)
    bytes_f32 = C * HW * 4              # f32 working set of one batch element
    budget = phys_vmem // 6             # double-buffered tile + temps + headroom
    target = min(4 << 20, max(budget // 4, 1 << 20))   # ~HBM roofline sweet spot

    if block_b is None:
        bb = max(1, min(64, target // max(bytes_f32, 1)))
        if bb >= B:
            # whole batch fits comfortably; prefer 2 pipelined steps when cheap
            block_b = B // 2 if (B >= 16 and B % 16 == 0) else B
        else:
            bb = max(8, (bb // 8) * 8)  # dense 2-D out blocks: sublane mult of 8
            while bb > 8 and 4 * bb * bytes_f32 > budget:
                bb -= 8
            block_b = bb
    # TODO(synk): for very large H*W (single-batch tile no longer fits VMEM,
    # hit ~2x earlier on v7x's 64 MiB) add an inner 'arbitrary' HW grid axis
    # with partial-sum stats instead of growing the tile.

    B_pad = ceil_div(B, block_b) * block_b
    if B_pad != B:                      # pad batch instead of degenerating to 1
        x_flat = jnp.pad(x_flat, ((0, B_pad - B), (0, 0), (0, 0)))
    grid = B_pad // block_b

    x_itemsize = jnp.dtype(x_flat.dtype).itemsize
    io_bytes = block_b * C * HW * x_itemsize + block_b * HW * 4
    work_bytes = block_b * C * HW * 4
    vmem_limit = int(min(max(2 * io_bytes + 3 * work_bytes + (8 << 20), 32 << 20),
                         phys_vmem * 0.9))

    const2 = lambda i: (0, 0)

    def _run(dim_sem, dense):
        kernel = functools.partial(_qselection_kernel, eps=eps,
                                   dense_epilogue=dense)
        return pl.pallas_call(
            kernel,
            out_shape=jax.ShapeDtypeStruct((B_pad, HW), jnp.float32),
            grid=(grid,),
            in_specs=[
                pl.BlockSpec((block_b, C, HW), lambda i: (i, 0, 0)),  # x
                pl.BlockSpec((1, HW), const2),                        # resized prior
                pl.BlockSpec((C, Ch), const2),                        # conv1 W^T (BN folded)
                pl.BlockSpec((1, Ch), const2),                        # conv1 bias (BN folded)
                pl.BlockSpec((Ch, C), const2),                        # conv2 W^T (/tau)
                pl.BlockSpec((1, C), const2),                         # conv2 bias (/tau)
            ],
            out_specs=pl.BlockSpec((block_b, HW), lambda i: (i, 0)),
            scratch_shapes=[pltpu.VMEM((block_b, HW), jnp.float32)],
            compiler_params=pltpu.CompilerParams(
                dimension_semantics=(dim_sem,),
                vmem_limit_bytes=vmem_limit),
        )(x_flat, prior_row,
          w1t.astype(jnp.float32), b1.astype(jnp.float32),
          w2t.astype(jnp.float32), b2.astype(jnp.float32))

    # v7x has 2 TensorCores with per-core HBM BW: shard the batch axis across
    # cores there; v5e/v6e (1 TC) keep plain "parallel".
    try:
        device_kind = jax.devices()[0].device_kind.lower()
    except Exception:
        device_kind = ""
    want_cp = (("v7" in device_kind or "tpu7" in device_kind)
               and grid >= 2 and grid % 2 == 0)

    attempts = []
    if want_cp:
        attempts += [(pltpu.CORE_PARALLEL, True), (pltpu.CORE_PARALLEL, False)]
    attempts += [(pltpu.PARALLEL, True), (pltpu.PARALLEL, False)]

    out = None
    last_err = None
    for dim_sem, dense in attempts:
        try:
            out = _run(dim_sem, dense)
            break
        except Exception as e:          # lowering/compile fallback only
            last_err = e
    if out is None:
        raise last_err

    return out[:B].reshape(B, 1, H, W)


# ----------------------------------------------------------------------------
# Pure-JAX reference (mirrors the PyTorch forward) for validation.
# ----------------------------------------------------------------------------
def reference_forward(x, params, tau_channel=1.0):
    eps = 1e-5
    hp = jax.lax.Precision.HIGHEST
    gap = jnp.mean(x, axis=(2, 3))                                  # [B, C]
    h = jnp.dot(gap, params["w1"].T, precision=hp) + params["b1"]   # [B, Ch]
    h = (h - params["bn_rm"]) / jnp.sqrt(params["bn_rv"] + eps)
    h = h * params["bn_gamma"] + params["bn_beta"]
    h = jnp.maximum(h, 0.0)
    logits = (jnp.dot(h, params["w2"].T, precision=hp)
              + params["b2"]) / tau_channel                         # [B, C]
    ex = jax.nn.softmax(logits, axis=1)
    mean = jnp.mean(x, axis=(2, 3), keepdims=True)
    var = jnp.mean((x - mean) ** 2, axis=(2, 3), keepdims=True)     # biased
    i_n = (x - mean) / jnp.sqrt(var + eps)
    m = jnp.sum(i_n * ex[:, :, None, None], axis=1, keepdims=True)
    prior_i = bilinear_resize(params["prior"][0, 0],
                              x.shape[2], x.shape[3])[None, None]
    return jax.nn.sigmoid(m * prior_i)


if __name__ == "__main__":
    # Shapes consistent with the module: d_model=64 (r=16 -> hidden=4),
    # batch=2, spatial=16x16, prior parameter 128x128.
    B, C, H, W = 2, 64, 16, 16
    r = 16
    Ch = C // r

    key = jax.random.PRNGKey(0)
    k1, k2, k3, k4, kx = jax.random.split(key, 5)

    params = dict(
        w1=jax.random.normal(k1, (Ch, C), jnp.float32) * 0.1,   # Conv2d(C, C//r, 1)
        b1=jax.random.normal(k2, (Ch,), jnp.float32) * 0.05,
        bn_gamma=jnp.ones((Ch,), jnp.float32),
        bn_beta=jnp.zeros((Ch,), jnp.float32),
        bn_rm=jnp.zeros((Ch,), jnp.float32),
        bn_rv=jnp.ones((Ch,), jnp.float32),
        w2=jax.random.normal(k3, (C, Ch), jnp.float32) * 0.1,   # Conv2d(C//r, C, 1)
        b2=jax.random.normal(k4, (C,), jnp.float32) * 0.05,
        prior=jnp.ones((1, 1, 128, 128), jnp.float32),          # as in __init__
    )
    x = jax.random.normal(kx, (B, C, H, W), jnp.float32)

    # Cache the bilinear-resized prior once per (H, W) and reuse it.
    prior_rs = bilinear_resize(params["prior"][0, 0], H, W)

    # f32 path: exact check against the reference forward.
    out = qselection_forward(x, params, tau_channel=1.0, prior_resized=prior_rs)
    out = jax.block_until_ready(out)
    ref = jax.block_until_ready(reference_forward(x, params, tau_channel=1.0))
    assert out.shape == (B, 1, H, W), out.shape
    np.testing.assert_allclose(np.asarray(out), np.asarray(ref),
                               rtol=1e-5, atol=2e-5)

    # bf16 input path (halves HBM traffic; stats/softmax stay f32 in-kernel).
    out_bf16 = jax.block_until_ready(
        qselection_forward(x.astype(jnp.bfloat16), params, tau_channel=1.0,
                           prior_resized=prior_rs))
    assert out_bf16.shape == (B, 1, H, W), out_bf16.shape
    np.testing.assert_allclose(np.asarray(out_bf16, dtype=np.float32),
                               np.asarray(ref), atol=5e-2)

    print("KERNEL_OK")
</pallas_src>

<mosaic_0001>
module attributes {stable_mosaic.version = 11 : i64} {
  func.func @_qselection_kernel(%arg0: i32, %arg1: memref<2x64x256xf32, #tpu.memory_space<vmem>>, %arg2: memref<1x256xf32, #tpu.memory_space<vmem>>, %arg3: memref<64x4xf32, #tpu.memory_space<vmem>>, %arg4: memref<1x4xf32, #tpu.memory_space<vmem>>, %arg5: memref<4x64xf32, #tpu.memory_space<vmem>>, %arg6: memref<1x64xf32, #tpu.memory_space<vmem>>, %arg7: memref<2x256xf32, #tpu.memory_space<vmem>>, %arg8: memref<2x256xf32, #tpu.memory_space<vmem>>) attributes {dimension_semantics = [#tpu.dimension_semantics<parallel>], iteration_bounds = array<i64: 1>, scalar_prefetch = 0 : i64, scratch_operands = 1 : i64, tpu.core_type = #tpu.core_type<tc>, window_params = [{transform_indices = @transform_0, window_bounds = array<i64: 2, 64, 256>}, {pipeline_mode = #tpu.pipeline_mode<synchronous>, transform_indices = @transform_1, window_bounds = array<i64: 1, 256>}, {pipeline_mode = #tpu.pipeline_mode<synchronous>, transform_indices = @transform_2, window_bounds = array<i64: 64, 4>}, {pipeline_mode = #tpu.pipeline_mode<synchronous>, transform_indices = @transform_3, window_bounds = array<i64: 1, 4>}, {pipeline_mode = #tpu.pipeline_mode<synchronous>, transform_indices = @transform_4, window_bounds = array<i64: 4, 64>}, {pipeline_mode = #tpu.pipeline_mode<synchronous>, transform_indices = @transform_5, window_bounds = array<i64: 1, 64>}, {transform_indices = @transform_6, window_bounds = array<i64: 2, 256>}]} {
    %c0 = arith.constant 0 : index
    %c0_0 = arith.constant 0 : index
    %c0_1 = arith.constant 0 : index
    %0 = vector.load %arg1[%c0, %c0_0, %c0_1] : memref<2x64x256xf32, #tpu.memory_space<vmem>>, vector<2x64x256xf32>
    %cst = arith.constant dense<0.000000e+00> : vector<2x64xf32>
    %1 = vector.multi_reduction <add>, %0, %cst [2] : vector<2x64x256xf32> to vector<2x64xf32>
    %cst_2 = arith.constant 3.906250e-03 : f32
    %2 = vector.broadcast %cst_2 : f32 to vector<2x64xf32>
    %3 = arith.mulf %1, %2 : vector<2x64xf32>
    %4 = arith.mulf %0, %0 : vector<2x64x256xf32>
    %cst_3 = arith.constant dense<0.000000e+00> : vector<2x64xf32>
    %5 = vector.multi_reduction <add>, %4, %cst_3 [2] : vector<2x64x256xf32> to vector<2x64xf32>
    %cst_4 = arith.constant 3.906250e-03 : f32
    %6 = vector.broadcast %cst_4 : f32 to vector<2x64xf32>
    %7 = arith.mulf %5, %6 : vector<2x64xf32>
    %8 = arith.mulf %3, %3 : vector<2x64xf32>
    %9 = arith.subf %7, %8 : vector<2x64xf32>
    %cst_5 = arith.constant 0.000000e+00 : f32
    %10 = vector.broadcast %cst_5 : f32 to vector<2x64xf32>
    %11 = arith.maximumf %9, %10 : vector<2x64xf32>
    %c0_6 = arith.constant 0 : index
    %c0_7 = arith.constant 0 : index
    %12 = vector.load %arg3[%c0_6, %c0_7] : memref<64x4xf32, #tpu.memory_space<vmem>>, vector<64x4xf32>
    %cst_8 = arith.constant dense<0.000000e+00> : vector<2x4xf32>
    %13 = tpu.matmul %3, %12, %cst_8 {dimension_numbers = #tpu.dot_dimension_numbers<[1], [0], [0], [1], [0, 0, 1, 1], [], []>} : vector<2x64xf32>, vector<64x4xf32>, vector<2x4xf32> -> vector<2x4xf32>
    %c0_9 = arith.constant 0 : index
    %c0_10 = arith.constant 0 : index
    %14 = vector.load %arg4[%c0_9, %c0_10] : memref<1x4xf32, #tpu.memory_space<vmem>>, vector<1x4xf32>
    %15 = vector.broadcast %14 : vector<1x4xf32> to vector<2x4xf32>
    %16 = arith.addf %13, %15 : vector<2x4xf32>
    %cst_11 = arith.constant 0.000000e+00 : f32
    %17 = vector.broadcast %cst_11 : f32 to vector<2x4xf32>
    %18 = arith.maximumf %16, %17 : vector<2x4xf32>
    %c0_12 = arith.constant 0 : index
    %c0_13 = arith.constant 0 : index
    %19 = vector.load %arg5[%c0_12, %c0_13] : memref<4x64xf32, #tpu.memory_space<vmem>>, vector<4x64xf32>
    %cst_14 = arith.constant dense<0.000000e+00> : vector<2x64xf32>
    %20 = tpu.matmul %18, %19, %cst_14 {dimension_numbers = #tpu.dot_dimension_numbers<[1], [0], [0], [1], [0, 0, 1, 1], [], []>} : vector<2x4xf32>, vector<4x64xf32>, vector<2x64xf32> -> vector<2x64xf32>
    %c0_15 = arith.constant 0 : index
    %c0_16 = arith.constant 0 : index
    %21 = vector.load %arg6[%c0_15, %c0_16] : memref<1x64xf32, #tpu.memory_space<vmem>>, vector<1x64xf32>
    %22 = vector.broadcast %21 : vector<1x64xf32> to vector<2x64xf32>
    %23 = arith.addf %20, %22 : vector<2x64xf32>
    %cst_17 = arith.constant dense<0xFF800000> : vector<2xf32>
    %24 = vector.multi_reduction <maximumf>, %23, %cst_17 [1] : vector<2x64xf32> to vector<2xf32>
    %25 = vector.shape_cast %24 : vector<2xf32> to vector<2x1xf32>
    %26 = vector.broadcast %25 : vector<2x1xf32> to vector<2x64xf32>
    %27 = arith.subf %23, %26 : vector<2x64xf32>
    %28 = math.exp %27 : vector<2x64xf32>
    %cst_18 = arith.constant dense<0.000000e+00> : vector<2xf32>
    %29 = vector.multi_reduction <add>, %28, %cst_18 [1] : vector<2x64xf32> to vector<2xf32>
    %30 = vector.shape_cast %29 : vector<2xf32> to vector<2x1xf32>
    %31 = vector.broadcast %30 : vector<2x1xf32> to vector<2x64xf32>
    %32 = arith.divf %28, %31 : vector<2x64xf32>
    %cst_19 = arith.constant 9.99999974E-6 : f32
    %33 = vector.broadcast %cst_19 : f32 to vector<2x64xf32>
    %34 = arith.addf %11, %33 : vector<2x64xf32>
    %35 = math.rsqrt %34 : vector<2x64xf32>
    %36 = arith.mulf %32, %35 : vector<2x64xf32>
    %37 = arith.mulf %36, %3 : vector<2x64xf32>
    %cst_20 = arith.constant dense<0.000000e+00> : vector<2xf32>
    %38 = vector.multi_reduction <add>, %37, %cst_20 [1] : vector<2x64xf32> to vector<2xf32>
    %39 = vector.shape_cast %38 : vector<2xf32> to vector<2x1xf32>
    %c0_21 = arith.constant 0 : index
    %c0_22 = arith.constant 0 : index
    %40 = vector.load %arg2[%c0_21, %c0_22] : memref<1x256xf32, #tpu.memory_space<vmem>>, vector<1x256xf32>
    %c0_23 = arith.constant 0 : index
    %c0_24 = arith.constant 0 : index
    %c0_25 = arith.constant 0 : index
    %41 = vector.load %arg1[%c0_23, %c0_24, %c0_25] : memref<2x64x256xf32, #tpu.memory_space<vmem>>, vector<2x64x256xf32>
    %42 = vector.shape_cast %36 : vector<2x64xf32> to vector<2x64x1xf32>
    %43 = vector.broadcast %42 : vector<2x64x1xf32> to vector<2x64x256xf32>
    %44 = arith.mulf %41, %43 : vector<2x64x256xf32>
    %cst_26 = arith.constant dense<0.000000e+00> : vector<2x256xf32>
    %45 = vector.multi_reduction <add>, %44, %cst_26 [1] : vector<2x64x256xf32> to vector<2x256xf32>
    %46 = vector.broadcast %39 : vector<2x1xf32> to vector<2x256xf32>
    %47 = arith.subf %45, %46 : vector<2x256xf32>
    %48 = vector.broadcast %40 : vector<1x256xf32> to vector<2x256xf32>
    %49 = arith.mulf %47, %48 : vector<2x256xf32>
    %50 = arith.negf %49 : vector<2x256xf32>
    %51 = math.exp %50 : vector<2x256xf32>
    %cst_27 = arith.constant 1.000000e+00 : f32
    %52 = vector.broadcast %cst_27 : f32 to vector<2x256xf32>
    %53 = arith.addf %52, %51 : vector<2x256xf32>
    %54 = arith.divf %52, %53 : vector<2x256xf32>
    %c0_28 = arith.constant 0 : index
    %c0_29 = arith.constant 0 : index
    %55 = vector.load %arg7[%c0_28, %c0_29] : memref<2x256xf32, #tpu.memory_space<vmem>>, vector<2x256xf32>
    tpu.vector_store %arg7[%c0_28, %c0_29], %54 {strides = array<i32>} : memref<2x256xf32, #tpu.memory_space<vmem>>, vector<2x256xf32>,
    return
  }
  func.func @transform_0(%arg0: i32) -> (i32, i32, i32) {
    %c0_i32 = arith.constant 0 : i32
    %c0_i32_0 = arith.constant 0 : i32
    %c0_i32_1 = arith.constant 0 : i32
    return %arg0, %c0_i32, %c0_i32_0 : i32, i32, i32
  }
  func.func @transform_1(%arg0: i32) -> (i32, i32) {
    %c0_i32 = arith.constant 0 : i32
    %c0_i32_0 = arith.constant 0 : i32
    %c0_i32_1 = arith.constant 0 : i32
    return %c0_i32, %c0_i32_0 : i32, i32
  }
  func.func @transform_2(%arg0: i32) -> (i32, i32) {
    %c0_i32 = arith.constant 0 : i32
    %c0_i32_0 = arith.constant 0 : i32
    %c0_i32_1 = arith.constant 0 : i32
    return %c0_i32, %c0_i32_0 : i32, i32
  }
  func.func @transform_3(%arg0: i32) -> (i32, i32) {
    %c0_i32 = arith.constant 0 : i32
    %c0_i32_0 = arith.constant 0 : i32
    %c0_i32_1 = arith.constant 0 : i32
    return %c0_i32, %c0_i32_0 : i32, i32
  }
  func.func @transform_4(%arg0: i32) -> (i32, i32) {
    %c0_i32 = arith.constant 0 : i32
    %c0_i32_0 = arith.constant 0 : i32
    %c0_i32_1 = arith.constant 0 : i32
    return %c0_i32, %c0_i32_0 : i32, i32
  }
  func.func @transform_5(%arg0: i32) -> (i32, i32) {
    %c0_i32 = arith.constant 0 : i32
    %c0_i32_0 = arith.constant 0 : i32
    %c0_i32_1 = arith.constant 0 : i32
    return %c0_i32, %c0_i32_0 : i32, i32
  }
  func.func @transform_6(%arg0: i32) -> (i32, i32) {
    %c0_i32 = arith.constant 0 : i32
    %c0_i32_0 = arith.constant 0 : i32
    return %arg0, %c0_i32 : i32, i32
  }
}

module attributes {stable_mosaic.version = 11 : i64} {
  func.func @_qselection_kernel(%arg0: i32, %arg1: memref<2x64x256xf32, #tpu.memory_space<vmem>>, %arg2: memref<1x256xf32, #tpu.memory_space<vmem>>, %arg3: memref<64x4xf32, #tpu.memory_space<vmem>>, %arg4: memref<1x4xf32, #tpu.memory_space<vmem>>, %arg5: memref<4x64xf32, #tpu.memory_space<vmem>>, %arg6: memref<1x64xf32, #tpu.memory_space<vmem>>, %arg7: memref<2x256xf32, #tpu.memory_space<vmem>>, %arg8: memref<2x256xf32, #tpu.memory_space<vmem>>) attributes {dimension_semantics = [#tpu.dimension_semantics<parallel>], iteration_bounds = array<i64: 1>, scalar_prefetch = 0 : i64, scratch_operands = 1 : i64, tpu.core_type = #tpu.core_type<tc>, window_params = [{transform_indices = @transform_0, window_bounds = array<i64: 2, 64, 256>}, {pipeline_mode = #tpu.pipeline_mode<synchronous>, transform_indices = @transform_1, window_bounds = array<i64: 1, 256>}, {pipeline_mode = #tpu.pipeline_mode<synchronous>, transform_indices = @transform_2, window_bounds = array<i64: 64, 4>}, {pipeline_mode = #tpu.pipeline_mode<synchronous>, transform_indices = @transform_3, window_bounds = array<i64: 1, 4>}, {pipeline_mode = #tpu.pipeline_mode<synchronous>, transform_indices = @transform_4, window_bounds = array<i64: 4, 64>}, {pipeline_mode = #tpu.pipeline_mode<synchronous>, transform_indices = @transform_5, window_bounds = array<i64: 1, 64>}, {transform_indices = @transform_6, window_bounds = array<i64: 2, 256>}]} {
    %c0 = arith.constant 0 : index
    %c0_0 = arith.constant 0 : index
    %c0_1 = arith.constant 0 : index
    %0 = vector.load %arg1[%c0, %c0_0, %c0_1] : memref<2x64x256xf32, #tpu.memory_space<vmem>>, vector<2x64x256xf32>
    %cst = arith.constant dense<0.000000e+00> : vector<2x64xf32>
    %1 = vector.multi_reduction <add>, %0, %cst [2] : vector<2x64x256xf32> to vector<2x64xf32>
    %cst_2 = arith.constant 3.906250e-03 : f32
    %2 = vector.broadcast %cst_2 : f32 to vector<2x64xf32>
    %3 = arith.mulf %1, %2 : vector<2x64xf32>
    %4 = arith.mulf %0, %0 : vector<2x64x256xf32>
    %cst_3 = arith.constant dense<0.000000e+00> : vector<2x64xf32>
    %5 = vector.multi_reduction <add>, %4, %cst_3 [2] : vector<2x64x256xf32> to vector<2x64xf32>
    %cst_4 = arith.constant 3.906250e-03 : f32
    %6 = vector.broadcast %cst_4 : f32 to vector<2x64xf32>
    %7 = arith.mulf %5, %6 : vector<2x64xf32>
    %8 = arith.mulf %3, %3 : vector<2x64xf32>
    %9 = arith.subf %7, %8 : vector<2x64xf32>
    %cst_5 = arith.constant 0.000000e+00 : f32
    %10 = vector.broadcast %cst_5 : f32 to vector<2x64xf32>
    %11 = arith.maximumf %9, %10 : vector<2x64xf32>
    %c0_6 = arith.constant 0 : index
    %c0_7 = arith.constant 0 : index
    %12 = vector.load %arg3[%c0_6, %c0_7] : memref<64x4xf32, #tpu.memory_space<vmem>>, vector<64x4xf32>
    %cst_8 = arith.constant dense<0.000000e+00> : vector<2x4xf32>
    %13 = tpu.matmul %3, %12, %cst_8 {dimension_numbers = #tpu.dot_dimension_numbers<[1], [0], [0], [1], [0, 0, 1, 1], [], []>} : vector<2x64xf32>, vector<64x4xf32>, vector<2x4xf32> -> vector<2x4xf32>
    %c0_9 = arith.constant 0 : index
    %c0_10 = arith.constant 0 : index
    %14 = vector.load %arg4[%c0_9, %c0_10] : memref<1x4xf32, #tpu.memory_space<vmem>>, vector<1x4xf32>
    %15 = vector.broadcast %14 : vector<1x4xf32> to vector<2x4xf32>
    %16 = arith.addf %13, %15 : vector<2x4xf32>
    %cst_11 = arith.constant 0.000000e+00 : f32
    %17 = vector.broadcast %cst_11 : f32 to vector<2x4xf32>
    %18 = arith.maximumf %16, %17 : vector<2x4xf32>
    %c0_12 = arith.constant 0 : index
    %c0_13 = arith.constant 0 : index
    %19 = vector.load %arg5[%c0_12, %c0_13] : memref<4x64xf32, #tpu.memory_space<vmem>>, vector<4x64xf32>
    %cst_14 = arith.constant dense<0.000000e+00> : vector<2x64xf32>
    %20 = tpu.matmul %18, %19, %cst_14 {dimension_numbers = #tpu.dot_dimension_numbers<[1], [0], [0], [1], [0, 0, 1, 1], [], []>} : vector<2x4xf32>, vector<4x64xf32>, vector<2x64xf32> -> vector<2x64xf32>
    %c0_15 = arith.constant 0 : index
    %c0_16 = arith.constant 0 : index
    %21 = vector.load %arg6[%c0_15, %c0_16] : memref<1x64xf32, #tpu.memory_space<vmem>>, vector<1x64xf32>
    %22 = vector.broadcast %21 : vector<1x64xf32> to vector<2x64xf32>
    %23 = arith.addf %20, %22 : vector<2x64xf32>
    %cst_17 = arith.constant dense<0xFF800000> : vector<2xf32>
    %24 = vector.multi_reduction <maximumf>, %23, %cst_17 [1] : vector<2x64xf32> to vector<2xf32>
    %25 = vector.shape_cast %24 : vector<2xf32> to vector<2x1xf32>
    %26 = vector.broadcast %25 : vector<2x1xf32> to vector<2x64xf32>
    %27 = arith.subf %23, %26 : vector<2x64xf32>
    %28 = math.exp %27 : vector<2x64xf32>
    %cst_18 = arith.constant dense<0.000000e+00> : vector<2xf32>
    %29 = vector.multi_reduction <add>, %28, %cst_18 [1] : vector<2x64xf32> to vector<2xf32>
    %30 = vector.shape_cast %29 : vector<2xf32> to vector<2x1xf32>
    %31 = vector.broadcast %30 : vector<2x1xf32> to vector<2x64xf32>
    %32 = arith.divf %28, %31 : vector<2x64xf32>
    %cst_19 = arith.constant 9.99999974E-6 : f32
    %33 = vector.broadcast %cst_19 : f32 to vector<2x64xf32>
    %34 = arith.addf %11, %33 : vector<2x64xf32>
    %35 = math.rsqrt %34 : vector<2x64xf32>
    %36 = arith.mulf %32, %35 : vector<2x64xf32>
    %37 = arith.mulf %36, %3 : vector<2x64xf32>
    %cst_20 = arith.constant dense<0.000000e+00> : vector<2xf32>
    %38 = vector.multi_reduction <add>, %37, %cst_20 [1] : vector<2x64xf32> to vector<2xf32>
    %39 = vector.shape_cast %38 : vector<2xf32> to vector<2x1xf32>
    %c0_21 = arith.constant 0 : index
    %c0_22 = arith.constant 0 : index
    %40 = vector.load %arg2[%c0_21, %c0_22] : memref<1x256xf32, #tpu.memory_space<vmem>>, vector<1x256xf32>
    %c0_23 = arith.constant 0 : index
    %c0_24 = arith.constant 0 : index
    %c0_25 = arith.constant 0 : index
    %41 = vector.load %arg1[%c0_23, %c0_24, %c0_25] : memref<2x64x256xf32, #tpu.memory_space<vmem>>, vector<1x64x256xf32>
    %42 = vector.shape_cast %41 : vector<1x64x256xf32> to vector<64x256xf32>
    %43 = vector.extract_strided_slice %36 {offsets = [0, 0], sizes = [1, 64], strides = [1, 1]} : vector<2x64xf32> to vector<1x64xf32>
    %cst_26 = arith.constant dense<0.000000e+00> : vector<1x256xf32>
    %44 = tpu.matmul %43, %42, %cst_26 {dimension_numbers = #tpu.dot_dimension_numbers<[1], [0], [0], [1], [0, 0, 1, 1], [], []>} : vector<1x64xf32>, vector<64x256xf32>, vector<1x256xf32> -> vector<1x256xf32>
    %c0_27 = arith.constant 0 : index
    %c0_28 = arith.constant 0 : index
    %45 = vector.load %arg8[%c0_27, %c0_28] : memref<2x256xf32, #tpu.memory_space<vmem>>, vector<1x256xf32>
    tpu.vector_store %arg8[%c0_27, %c0_28], %44 {strides = array<i32>} : memref<2x256xf32, #tpu.memory_space<vmem>>, vector<1x256xf32>,
    %c1 = arith.constant 1 : index
    %c0_29 = arith.constant 0 : index
    %c0_30 = arith.constant 0 : index
    %46 = vector.load %arg1[%c1, %c0_29, %c0_30] : memref<2x64x256xf32, #tpu.memory_space<vmem>>, vector<1x64x256xf32>
    %47 = vector.shape_cast %46 : vector<1x64x256xf32> to vector<64x256xf32>
    %48 = vector.extract_strided_slice %36 {offsets = [1, 0], sizes = [1, 64], strides = [1, 1]} : vector<2x64xf32> to vector<1x64xf32>
    %cst_31 = arith.constant dense<0.000000e+00> : vector<1x256xf32>
    %49 = tpu.matmul %48, %47, %cst_31 {dimension_numbers = #tpu.dot_dimension_numbers<[1], [0], [0], [1], [0, 0, 1, 1], [], []>} : vector<1x64xf32>, vector<64x256xf32>, vector<1x256xf32> -> vector<1x256xf32>
    %c1_32 = arith.constant 1 : index
    %c0_33 = arith.constant 0 : index
    %50 = vector.load %arg8[%c1_32, %c0_33] : memref<2x256xf32, #tpu.memory_space<vmem>>, vector<1x256xf32>
    tpu.vector_store %arg8[%c1_32, %c0_33], %49 {strides = array<i32>} : memref<2x256xf32, #tpu.memory_space<vmem>>, vector<1x256xf32>,
    %c0_34 = arith.constant 0 : index
    %c0_35 = arith.constant 0 : index
    %51 = vector.load %arg8[%c0_34, %c0_35] : memref<2x256xf32, #tpu.memory_space<vmem>>, vector<2x256xf32>
    %52 = vector.broadcast %39 : vector<2x1xf32> to vector<2x256xf32>
    %53 = arith.subf %51, %52 : vector<2x256xf32>
    %54 = vector.broadcast %40 : vector<1x256xf32> to vector<2x256xf32>
    %55 = arith.mulf %53, %54 : vector<2x256xf32>
    %56 = arith.negf %55 : vector<2x256xf32>
    %57 = math.exp %56 : vector<2x256xf32>
    %cst_36 = arith.constant 1.000000e+00 : f32
    %58 = vector.broadcast %cst_36 : f32 to vector<2x256xf32>
    %59 = arith.addf %58, %57 : vector<2x256xf32>
    %60 = arith.divf %58, %59 : vector<2x256xf32>
    %c0_37 = arith.constant 0 : index
    %c0_38 = arith.constant 0 : index
    %61 = vector.load %arg7[%c0_37, %c0_38] : memref<2x256xf32, #tpu.memory_space<vmem>>, vector<2x256xf32>
    tpu.vector_store %arg7[%c0_37, %c0_38], %60 {strides = array<i32>} : memref<2x256xf32, #tpu.memory_space<vmem>>, vector<2x256xf32>,
    return
  }
  func.func @transform_0(%arg0: i32) -> (i32, i32, i32) {
    %c0_i32 = arith.constant 0 : i32
    %c0_i32_0 = arith.constant 0 : i32
    %c0_i32_1 = arith.constant 0 : i32
    return %arg0, %c0_i32, %c0_i32_0 : i32, i32, i32
  }
  func.func @transform_1(%arg0: i32) -> (i32, i32) {
    %c0_i32 = arith.constant 0 : i32
    %c0_i32_0 = arith.constant 0 : i32
    %c0_i32_1 = arith.constant 0 : i32
    return %c0_i32, %c0_i32_0 : i32, i32
  }
  func.func @transform_2(%arg0: i32) -> (i32, i32) {
    %c0_i32 = arith.constant 0 : i32
    %c0_i32_0 = arith.constant 0 : i32
    %c0_i32_1 = arith.constant 0 : i32
    return %c0_i32, %c0_i32_0 : i32, i32
  }
  func.func @transform_3(%arg0: i32) -> (i32, i32) {
    %c0_i32 = arith.constant 0 : i32
    %c0_i32_0 = arith.constant 0 : i32
    %c0_i32_1 = arith.constant 0 : i32
    return %c0_i32, %c0_i32_0 : i32, i32
  }
  func.func @transform_4(%arg0: i32) -> (i32, i32) {
    %c0_i32 = arith.constant 0 : i32
    %c0_i32_0 = arith.constant 0 : i32
    %c0_i32_1 = arith.constant 0 : i32
    return %c0_i32, %c0_i32_0 : i32, i32
  }
  func.func @transform_5(%arg0: i32) -> (i32, i32) {
    %c0_i32 = arith.constant 0 : i32
    %c0_i32_0 = arith.constant 0 : i32
    %c0_i32_1 = arith.constant 0 : i32
    return %c0_i32, %c0_i32_0 : i32, i32
  }
  func.func @transform_6(%arg0: i32) -> (i32, i32) {
    %c0_i32 = arith.constant 0 : i32
    %c0_i32_0 = arith.constant 0 : i32
    return %arg0, %c0_i32 : i32, i32
  }
}

</mosaic_0001>

<bundles_post_ra>
// kernel: tpu_custom_call.1
= control target key start
LH: loop header
LB: loop body
LE: loop exit
PB: predicated region body
PF: predicated region fallthrough
CT: control target
= control target key end

     0   :  { %11 = vsyncpa [#allocation4], 0  ;;  %s1614_s0 = inlined_call_operand.hbm [shape: f32[2,64,256], index: 0, kind: input, shape index: {}]   ;;  %s1615_s1 = inlined_call_operand.vmem [shape: f32[1,256], index: 1, kind: input, shape index: {}]   ;;  %s1616_s2 = inlined_call_operand.vmem [shape: f32[64,4], index: 2, kind: input, shape index: {}]   ;;  %s1617_s3 = inlined_call_operand.vmem [shape: f32[1,4], index: 3, kind: input, shape index: {}]   ;;  %s1618_s4 = inlined_call_operand.vmem [shape: f32[4,64], index: 4, kind: input, shape index: {}]   ;;  %s1619_s5 = inlined_call_operand.vmem [shape: f32[1,64], index: 5, kind: input, shape index: {}]   ;;  %s1620_s6 = inlined_call_operand.hbm [shape: f32[2,256], index: 6, kind: output, shape index: {}]  }
   0x1   :  { %12 = vsyncpa [#allocation5], 0  ;;  %s1126_s21 = smov [#allocation3]   ;;  %s1078_s25 = scalar_lea.hbm %s1614_s0, 4096 }
   0x2   :  { %s18_s22 = sshll.u32 %s1126_s21, 4  ;;  %p1079_p0 = scmp.ne.s32.totalorder %s1614_s0, %s1078_s25  ;;  %s19_s22 = int_to_ptr.vmem [resolvable:$true] %s18_s22 }
   0x3   :  { %p1082_p1 = scmp.lt.u32.totalorder %s1078_s25, %s1614_s0 }
   0x5   :  { %p1084_p2 = pnand %p1082_p1, %p1079_p0 }
   0x7   :  { %1087 = shalt.err (!%p1084_p2)
}
   0x8   :  { %s1088_s30 = scalar_lea.vmem %s19_s22, 4096  ;;  %p1093_p4 = scmp.lt.s32.totalorder %s19_s22, %s19_s22 }
   0x9   :  { %p1089_p3 = scmp.ne.s32.totalorder %s19_s22, %s1088_s30  ;;  %p1094_p5 = scmp.lt.s32.totalorder %s1088_s30, %s1088_s30 }
   0xb   :  { %p1095_p6 = por %p1094_p5, %p1093_p4 }
   0xd   :  { %p1096_p7 = pnand %p1095_p6, %p1089_p3 }
   0xf   :  { %1099 = shalt.err (!%p1096_p7)
}
  0x10   :  { %s1127_s7 = smov 256   ;;  %s1128_s8 = smov 16  }
  0x11   :  { %24 = dma.hbm_to_vmem [thread:$0]  %s1614_s0, 4096, %s19_s22, [#allocation4], %s1127_s7, %s1127_s7, %s1128_s8  }
  0x12   :  { %1122 = dma.done.wait [#allocation4], 4096  }
  0x13   :  { %1123 = vsyncadd [#allocation4], 4294963200  ;;  %v1181_v0 = vld [vmem:[#allocation3 + $0x80] sm:$0xff]  ;;  %v1183_v1 = vld [vmem:[#allocation3 + $0x88] sm:$0xff]  ;;  %v1129_v59 = vmov 0.0|0.0   ;;  %vm1130_vm0 = vmmov 0  }
  0x14   :  { %1636 = vst [vmem:[#allocation9_spill] sm:$0xff] %v1181_v0  ;;  %1637 = vst [vmem:[#allocation10_spill] sm:$0xff] %v1183_v1  ;;  %v1185_v2 = vld [vmem:[#allocation3] sm:$0xff]  ;;  %v94_v3 = vadd.f32 %v1183_v1, %v1181_v0  ;;  %v1189_v4 = vld [vmem:[#allocation3 + $0x8] sm:$0xff]  ;;  %v150_v50 = vmul.f32 %v1181_v0, %v1181_v0  ;;  %v151_v51 = vmul.f32 %v1183_v1, %v1183_v1  ;;  %1006 = vmatprep.subr.bf16.mxu0 %v1129_v59  ;;  %vm320_vm1 = vcmask 130112  }
  0x15   :  { %v1191_v5 = vld [vmem:[#allocation3 + $0x90] sm:$0xff]  ;;  %v1193_v6 = vld [vmem:[#allocation3 + $0x98] sm:$0xff]  ;;  %v70_v7 = vadd.f32 %v1189_v4, %v1185_v2  ;;  %v1205_v12 = vld [vmem:[#allocation3 + $0xa0] sm:$0xff]  ;;  %v134_v47 = vmul.f32 %v1185_v2, %v1185_v2  ;;  %v135_v48 = vmul.f32 %v1189_v4, %v1189_v4  ;;  %vm327_vm2 = vcmask 195712  }
  0x16   :  { %v1197_v8 = vld [vmem:[#allocation3 + $0x10] sm:$0xff]  ;;  %v1199_v9 = vld [vmem:[#allocation3 + $0x18] sm:$0xff]  ;;  %95 = vadd.xlane.f32.xlu1 %v94_v3  ;;  %v97_v10 = vadd.f32 %v1193_v6, %v1191_v5  ;;  %v1207_v13 = vld [vmem:[#allocation3 + $0xa8] sm:$0xff]  ;;  %v190_v53 = vadd.f32 %v151_v51, %v150_v50  ;;  %vm334_vm3 = vcmask 261312   ;;  %vm341_vm4 = vcmask 326912  }
  0x17   :  { %71 = vadd.xlane.f32.xlu0 %v70_v7  ;;  %v73_v11 = vadd.f32 %v1199_v9, %v1197_v8  ;;  %v1209_v14 = vld [vmem:[#allocation3 + $0x20] sm:$0xff]  ;;  %v1211_v15 = vld [vmem:[#allocation3 + $0x28] sm:$0xff]  ;;  %v100_v16 = vadd.f32 %v1207_v13, %v1205_v12  ;;  %v1217_v18 = vld [vmem:[#allocation3 + $0xb0] sm:$0xff]  ;;  %v166_v52 = vadd.f32 %v135_v48, %v134_v47  ;;  %vm348_vm5 = vcmask 392512  }
  0x18   :  { %v76_v17 = vadd.f32 %v1211_v15, %v1209_v14  ;;  %v1219_v19 = vld [vmem:[#allocation3 + $0xb8] sm:$0xff]  ;;  %v1221_v20 = vld [vmem:[#allocation3 + $0x30] sm:$0xff]  ;;  %v1229_v24 = vld [vmem:[#allocation3 + $0xc0] sm:$0xff]  ;;  %v138_v56 = vmul.f32 %v1209_v14, %v1209_v14  ;;  %v139_v57 = vmul.f32 %v1211_v15, %v1211_v15  ;;  %vm355_vm6 = vcmask 458112  }
  0x19   :  { %1638 = vst [vmem:[#allocation11_spill] sm:$0xff] %v1221_v20  ;;  %v1223_v21 = vld [vmem:[#allocation3 + $0x38] sm:$0xff]  ;;  %v103_v22 = vadd.f32 %v1219_v19, %v1217_v18  ;;  %v1231_v25 = vld [vmem:[#allocation3 + $0xc8] sm:$0xff]  ;;  %v1233_v26 = vld [vmem:[#allocation3 + $0x40] sm:$0xff]  ;;  %v140_v63 = vmul.f32 %v1221_v20, %v1221_v20  ;;  %vm362_vm7 = vcmask 523712   ;;  %vm403_vm8 = vcmask 1041409  }
  0x1a   :  { %98 = vadd.xlane.f32.xlu1 %v97_v10  ;;  %1639 = vst [vmem:[#allocation12_spill] sm:$0xff] %v1223_v21  ;;  %v79_v23 = vadd.f32 %v1223_v21, %v1221_v20  ;;  %1640 = vst [vmem:[#allocation13_spill] sm:$0xff] %v1233_v26  ;;  %v1235_v27 = vld [vmem:[#allocation3 + $0x48] sm:$0xff]  ;;  %v106_v28 = vadd.f32 %v1231_v25, %v1229_v24  ;;  %v1241_v30 = vld [vmem:[#allocation3 + $0xd0] sm:$0xff]  ;;  %v172_v62 = vadd.f32 %v139_v57, %v138_v56  ;;  %vm405_vm9 = vcmask 523264  }
  0x1b   :  { %74 = vadd.xlane.f32.xlu0 %v73_v11  ;;  %1641 = vst [vmem:[#allocation14_spill] sm:$0xff] %v1235_v27  ;;  %v82_v29 = vadd.f32 %v1235_v27, %v1233_v26  ;;  %v1243_v31 = vld [vmem:[#allocation3 + $0xd8] sm:$0xff]  ;;  %v1245_v32 = vld [vmem:[#allocation3 + $0x50] sm:$0xff]  ;;  %v1253_v36 = vld [vmem:[#allocation3 + $0xe0] sm:$0xff]  ;;  %v141_v3 = vmul.f32 %v1223_v21, %v1223_v21  ;;  %vm491_vm10 = vcmask 1043456   ;;  %vm487_vm11 = vcmask 31744  }
  0x1c   :  { %1642 = vst [vmem:[#allocation15_spill] sm:$0xff] %v1245_v32  ;;  %v1247_v33 = vld [vmem:[#allocation3 + $0x58] sm:$0xff]  ;;  %v109_v34 = vadd.f32 %v1243_v31, %v1241_v30  ;;  %v1255_v37 = vld [vmem:[#allocation3 + $0xe8] sm:$0xff]  ;;  %v1257_v38 = vld [vmem:[#allocation3 + $0x60] sm:$0xff]  ;;  %vm565_vm12 = vcmask 517120   ;;  %vm939_vm13 = vcmask 1043459  }
  0x1d   :  { %1643 = vst [vmem:[#allocation16_spill] sm:$0xff] %v1247_v33  ;;  %v85_v35 = vadd.f32 %v1247_v33, %v1245_v32  ;;  %1644 = vst [vmem:[#allocation17_spill] sm:$0xff] %v1255_v37  ;;  %v1259_v39 = vld [vmem:[#allocation3 + $0x68] sm:$0xff]  ;;  %v112_v40 = vadd.f32 %v1255_v37, %v1253_v36  ;;  %v1265_v42 = vld [vmem:[#allocation3 + $0xf0] sm:$0xff]  ;;  %v146_v47 = vmul.f32 %v1257_v38, %v1257_v38  ;;  %vm941_vm14 = vcmask 1045509  }
  0x1e   :  { %101 = vadd.xlane.f32.xlu1 %v100_v16  ;;  %1645 = vst [vmem:[#allocation18_spill] sm:$0xff] %v1257_v38  ;;  %1646 = vst [vmem:[#allocation19_spill] sm:$0xff] %v1259_v39  ;;  %v88_v41 = vadd.f32 %v1259_v39, %v1257_v38  ;;  %v1267_v43 = vld [vmem:[#allocation3 + $0xf8] sm:$0xff]  ;;  %v1269_v44 = vld [vmem:[#allocation3 + $0x70] sm:$0xff]  ;;  %v175_v16 = vadd.f32 %v141_v3, %v140_v63  ;;  %v147_v48 = vmul.f32 %v1259_v39, %v1259_v39  ;;  %vm943_vm15 = vcmask 1047559  }
  0x1f   :  { %77 = vadd.xlane.f32.xlu0 %v76_v17  ;;  %1647 = vst [vmem:[#allocation20_spill] sm:$0xff] %v1265_v42  ;;  %1648 = vst [vmem:[#allocation21_spill] sm:$0xff] %v1267_v43  ;;  %v1271_v45 = vld [vmem:[#allocation3 + $0x78] sm:$0xff]  ;;  %v115_v46 = vadd.f32 %v1267_v43, %v1265_v42  ;;  %v278_v54 = vld [vmem:[%s1616_s2] sm:$0xff]  ;;  %v142_v17 = vmul.f32 %v1233_v26, %v1233_v26  ;;  %v148_v51 = vmul.f32 %v1269_v44, %v1269_v44 }
  0x20   :  { %1649 = vst [vmem:[#allocation22_spill] sm:$0xff] %v1269_v44  ;;  %1650 = vst [vmem:[#allocation23_spill] sm:$0xff] %v1271_v45  ;;  %v91_v49 = vadd.f32 %v1271_v45, %v1269_v44  ;;  %v279_v55 = vld [vmem:[%s1616_s2 + $0x8] sm:$0xff]  ;;  %v280_v60 = vld [vmem:[%s1616_s2 + $0x10] sm:$0xff]  ;;  %v184_v50 = vadd.f32 %v147_v48, %v146_v47 }
  0x21   :  { %v1007_v58 = vpack.c.bf16 %v279_v55, %v278_v54  ;;  %v281_v61 = vld [vmem:[%s1616_s2 + $0x18] sm:$0xff]  ;;  %v282_v10 = vld [vmem:[%s1616_s2 + $0x20] sm:$0xff]  ;;  %v283_v11 = vld [vmem:[%s1616_s2 + $0x28] sm:$0xff] }
  0x22   :  { %104 = vadd.xlane.f32.xlu1 %v103_v22  ;;  %v1010_v7 = vpack.c.bf16 %v281_v61, %v280_v60  ;;  %v143_v22 = vmul.f32 %v1235_v27, %v1235_v27 }
  0x23   :  { %80 = vadd.xlane.f32.xlu0 %v79_v23  ;;  %1008 = vmatpush3.bf16.msra.mxu0 %v1007_v58  ;;  %v1013_v23 = vpack.c.bf16 %v283_v11, %v282_v10  ;;  %v309_v58 = vlaneseq }
  0x24   :  { %1009 = vmatprep.subr.bf16.mxu0 %v1129_v59 }
  0x25   :  { %v310_v61 = vand.u32 127, %v309_v58  ;;  %v1333_v63 = vshrl.u32 %v309_v58, 7 }
  0x26   :  { %107 = vadd.xlane.f32.xlu1 %v106_v28  ;;  %v284_v28 = vld [vmem:[%s1616_s2 + $0x30] sm:$0xff] }
  0x27   :  { %83 = vadd.xlane.f32.xlu0 %v82_v29  ;;  %1011 = vmatpush3.bf16.msra.mxu0 %v1010_v7  ;;  %v285_v29 = vld [vmem:[%s1616_s2 + $0x38] sm:$0xff]  ;;  %v315_v7 = vadd.s32 4294967288, %v310_v61  ;;  %v322_v10 = vadd.s32 4294967280, %v310_v61  ;;  %v329_v11 = vadd.s32 4294967272, %v310_v61 }
  0x28   :  { %1012 = vmatprep.subr.bf16.mxu0 %v1129_v59 }
  0x2a   :  { %110 = vadd.xlane.f32.xlu1 %v109_v34  ;;  %v178_v34 = vadd.f32 %v143_v22, %v142_v17  ;;  %v343_v22 = vadd.s32 4294967256, %v310_v61 }
  0x2b   :  { %86 = vadd.xlane.f32.xlu0 %v85_v35  ;;  %1014 = vmatpush3.bf16.msra.mxu0 %v1013_v23  ;;  %v144_v35 = vmul.f32 %v1245_v32, %v1245_v32  ;;  %v1336_v23 = vsub.s32 %v310_v61, %v1333_v63 }
  0x2c   :  { %1015 = vmatprep.subr.bf16.mxu0 %v1129_v59 }
  0x2e   :  { %113 = vadd.xlane.f32.xlu1 %v112_v40  ;;  %v145_v40 = vmul.f32 %v1247_v33, %v1247_v33 }
  0x2f   :  { %89 = vadd.xlane.f32.xlu0 %v88_v41  ;;  %v1016_v41 = vpack.c.bf16 %v285_v29, %v284_v28  ;;  %v1339_v29 = vsub.s32 %v315_v7, %v1333_v63 }
  0x31   :  { %1017 = vmatpush3.bf16.msra.mxu0 %v1016_v41  ;;  %v1347_v41 = vsub.s32 %v329_v11, %v1333_v63 }
  0x32   :  { %116 = vadd.xlane.f32.xlu1 %v115_v46  ;;  %v181_v46 = vadd.f32 %v145_v40, %v144_v35  ;;  %v350_v35 = vadd.s32 4294967248, %v310_v61 }
  0x33   :  { %92 = vadd.xlane.f32.xlu0 %v91_v49  ;;  %v1131_v49 = vmov 0.0  }
  0x34   :  { %998 = vmatprep.mubr.msk.f32.mxu0 %vm1130_vm0, %v1131_v49  ;;  %1001 = vmatprep.subr.mxu1 %v1131_v49 }
  0x35   :  { %1003 = vmatprep.mubr.msk.f32.mxu1 %vm1130_vm0, %v1131_v49  ;;  %v1357_v49 = vsub.s32 %v343_v22, %v1333_v63 }
  0x36   :  { %167 = vadd.xlane.f32.xlu1 %v166_v52  ;;  %v149_v52 = vmul.f32 %v1271_v45, %v1271_v45 }
  0x3a   :  { %191 = vadd.xlane.f32.xlu1 %v190_v53  ;;  %v187_v53 = vadd.f32 %v149_v52, %v148_v51 }
  0x3e   :  { %173 = vadd.xlane.f32.xlu1 %v172_v62 }
  0x42   :  { %176 = vadd.xlane.f32.xlu1 %v175_v16  ;;  %v336_v16 = vadd.s32 4294967264, %v310_v61 }
  0x46   :  { %179 = vadd.xlane.f32.xlu1 %v178_v34  ;;  %v1342_v34 = vsub.s32 %v322_v10, %v1333_v63 }
  0x4a   :  { %182 = vadd.xlane.f32.xlu1 %v181_v46  ;;  %v1350_v46 = vsub.s32 %v336_v16, %v1333_v63 }
  0x4e   :  { %185 = vadd.xlane.f32.xlu1 %v184_v50 }
  0x52   :  { %188 = vadd.xlane.f32.xlu1 %v187_v53 }
  0xa3   :  { %v96_v54 = vpop.xlane.xlu1 %95 }
  0xa4   :  { %v72_v55 = vpop.xlane.xlu0 %71  ;;  %v126_v51 = vmul.f32 0.00390625, %v96_v54 }
  0xa5   :  { %v118_v58 = vmul.f32 0.00390625, %v72_v55 }
  0xa7   :  { %v99_v56 = vpop.xlane.xlu1 %98 }
  0xa8   :  { %v75_v57 = vpop.xlane.xlu0 %74  ;;  %v1344_v40 = vmul.f32 0.00390625, %v99_v56 }
  0xa9   :  { %v1352_v47 = vmul.f32 0.00390625, %v75_v57  ;;  %v1368_v57 = vsub.s32 %v350_v35, %v1333_v63 }
  0xab   :  { %v102_v59 = vpop.xlane.xlu1 %101 }
  0xac   :  { %v78_v60 = vpop.xlane.xlu0 %77  ;;  %v1354_v48 = vmul.f32 0.00390625, %v102_v59  ;;  %v371_v59 = vrot.slane %v1344_v40, %v1339_v29 }
  0xad   :  { %v1359_v52 = vmul.f32 0.00390625, %v78_v60  ;;  %v357_v60 = vadd.s32 4294967240, %v310_v61 }
  0xae   :  { %v376_v55 = vrot.slane %v1354_v48, %v1342_v34 }
  0xaf   :  { %v105_v62 = vpop.xlane.xlu1 %104  ;;  %v326_v22 = vrot.slane %v1359_v52, %v1342_v34  ;;  %v1402_v33 = vsub.s32 %v357_v60, %v1333_v63 }
  0xb0   :  { %v81_v3 = vpop.xlane.xlu0 %80  ;;  %v1361_v53 = vmul.f32 0.00390625, %v105_v62  ;;  %v319_v62 = vrot.slane %v1352_v47, %v1339_v29 }
  0xb1   :  { %v1363_v7 = vmul.f32 0.00390625, %v81_v3 }
  0xb3   :  { %v108_v17 = vpop.xlane.xlu1 %107  ;;  %v333_v45 = vrot.slane %v1363_v7, %v1347_v41 }
  0xb4   :  { %v84_v28 = vpop.xlane.xlu0 %83  ;;  %v1365_v10 = vmul.f32 0.00390625, %v108_v17  ;;  %v367_v17 = vrot.slane %v126_v51, %v1336_v23 }
  0xb5   :  { %v1372_v11 = vmul.f32 0.00390625, %v84_v28  ;;  %v381_v28 = vrot.slane %v1361_v53, %v1347_v41 }
  0xb6   :  { %v372_v39 = vsel %vm320_vm1, %v371_v59, %v367_v17 }
  0xb7   :  { %v111_v50 = vpop.xlane.xlu1 %110  ;;  %v340_v38 = vrot.slane %v1372_v11, %v1350_v46  ;;  %v377_v27 = vsel %vm327_vm2, %v376_v55, %v372_v39 }
  0xb8   :  { %v87_v56 = vpop.xlane.xlu0 %86  ;;  %v1374_v54 = vmul.f32 0.00390625, %v111_v50  ;;  %v314_v50 = vrot.slane %v118_v58, %v1336_v23  ;;  %v382_v21 = vsel %vm334_vm3, %v381_v28, %v377_v27 }
  0xb9   :  { %v1380_v3 = vmul.f32 0.00390625, %v87_v56  ;;  %v386_v56 = vrot.slane %v1365_v10, %v1350_v46 }
  0xba   :  { %v321_v32 = vsel %vm320_vm1, %v319_v62, %v314_v50 }
  0xbb   :  { %v114_v16 = vpop.xlane.xlu1 %113  ;;  %v347_v26 = vrot.slane %v1380_v3, %v1357_v49  ;;  %v328_v17 = vsel %vm327_vm2, %v326_v22, %v321_v32  ;;  %v387_v39 = vsel %vm341_vm4, %v386_v56, %v382_v21 }
  0xbc   :  { %v1387_v35 = vmul.f32 0.00390625, %v114_v16  ;;  %v90_v61 = vpop.xlane.xlu0 %89  ;;  %v391_v16 = vrot.slane %v1374_v54, %v1357_v49  ;;  %v335_v62 = vsel %vm334_vm3, %v333_v45, %v328_v17 }
  0xbd   :  { %v1394_v44 = vmul.f32 0.00390625, %v90_v61  ;;  %v342_v50 = vsel %vm341_vm4, %v340_v38, %v335_v62 }
  0xbe   :  { %v396_v61 = vrot.slane %v1387_v35, %v1368_v57  ;;  %v392_v0 = vsel %vm348_vm5, %v391_v16, %v387_v39  ;;  %v349_v32 = vsel %vm348_vm5, %v347_v26, %v342_v50  ;;  %v238_v26 = vmul.f32 %v126_v51, %v126_v51  ;;  %v479_v51 = vld [vmem:[%s1618_s4] sm:$0xf] }
  0xbf   :  { %v117_v59 = vpop.xlane.xlu1 %116  ;;  %v354_v20 = vrot.slane %v1394_v44, %v1368_v57  ;;  %1002 = vmatpush3.msk.msra.mxu1 %vm491_vm10, %v479_v51 }
  0xc0   :  { %v1414_v60 = vmul.f32 0.00390625, %v117_v59  ;;  %v93_v1 = vpop.xlane.xlu0 %92  ;;  %v397_v22 = vsel %vm355_vm6, %v396_v61, %v392_v0 }
  0xc1   :  { %v1418_v55 = vmul.f32 0.00390625, %v93_v1  ;;  %v230_v1 = vmul.f32 %v118_v58, %v118_v58  ;;  %v356_v21 = vsel %vm355_vm6, %v354_v20, %v349_v32 }
  0xc2   :  { %v401_v27 = vrot.slane %v1414_v60, %v1402_v33 }
  0xc3   :  { %v361_v45 = vrot.slane %v1418_v55, %v1402_v33  ;;  %v168_v28 = vpop.xlane.xlu1 %167 }
  0xc4   :  { %v214_v56 = vmul.f32 0.00390625, %v168_v28  ;;  %v402_v38 = vsel %vm362_vm7, %v401_v27, %v397_v22  ;;  %v962_v28 = vld [vmem:[%s1617_s3] ss:$0 sm:$0xff]  ;;  %v235_v27 = vmul.f32 %v1380_v3, %v1380_v3  ;;  %v231_v3 = vmul.f32 %v1352_v47, %v1352_v47 }
  0xc5   :  { %v363_v16 = vsel %vm362_vm7, %v361_v45, %v356_v21 }
  0xc6   :  { %v246_v59 = vsub.f32 %v214_v56, %v230_v1  ;;  %v1432_v17 = vsel %vm403_vm8, %v402_v38, %v363_v16  ;;  %v964_v16 = vld [vmem:[%s1619_s5] ss:$0 sm:$0xff] }
  0xc7   :  { %999 = vmatmul.mubr.msk.f32.vlgmr.msra.gmra.mrb[0].mxu0 %vm405_vm9, %v1432_v17  ;;  %v192_v0 = vpop.xlane.xlu1 %191 }
  0xc8   :  { %v262_v61 = vmax.f32 %v246_v59, 0.0  ;;  %v222_v62 = vmul.f32 0.00390625, %v192_v0  ;;  %v136_v0 = vmul.f32 %v1197_v8, %v1197_v8 }
  0xca   :  { %v577_v39 = vadd.f32 1e-05, %v262_v61  ;;  %v254_v50 = vsub.f32 %v222_v62, %v238_v26  ;;  %v137_v26 = vmul.f32 %v1199_v9, %v1199_v9 }
  0xcc   :  { %1026 = vrsqrt.f32 %v577_v39  ;;  %v270_v58 = vmax.f32 %v254_v50, 0.0  ;;  %v169_v50 = vadd.f32 %v137_v26, %v136_v0  ;;  %v159_v0 = vmul.f32 %v1231_v25, %v1231_v25 }
  0xce   :  { %v585_v20 = vadd.f32 1e-05, %v270_v58  ;;  %v152_v58 = vmul.f32 %v1191_v5, %v1191_v5 }
  0xd0   :  { %1028 = vrsqrt.f32 %v585_v20  ;;  %v153_v20 = vmul.f32 %v1193_v6, %v1193_v6 }
  0xd2   :  { %v193_v51 = vadd.f32 %v153_v20, %v152_v58  ;;  %v162_v58 = vmul.f32 %v1253_v36, %v1253_v36  ;;  %v163_v20 = vmul.f32 %v1255_v37, %v1255_v37 }
  0xd6   :  { %v1435_v32 = vpop.eup %1026 }
  0xda   :  { %v1439_v22 = vpop.eup %1028 }
 0x19a   :  { %v474_v1 = vpop.f32.mrb[0].mxu0 }
 0x19b   :  { %v475_v21 = vadd.f32 %v962_v28, %v474_v1  ;;  %v1000_v56 = vpop.f32.mrb[1].mxu0  ;;  %v154_v28 = vmul.f32 %v1205_v12, %v1205_v12  ;;  %v155_v1 = vmul.f32 %v1207_v13, %v1207_v13 }
 0x19c   :  { %v156_v56 = vmul.f32 %v1217_v18, %v1217_v18 }
 0x19d   :  { %v478_v38 = vmax.f32 %v475_v21, 0.0  ;;  %v196_v21 = vadd.f32 %v155_v1, %v154_v28  ;;  %v164_v28 = vmul.f32 %v1265_v42, %v1265_v42  ;;  %v165_v1 = vmul.f32 %v1267_v43, %v1267_v43 }
 0x19f   :  { %1004 = vmatmul.mubr.msk.f32.vlgmr.msra.gmra.mrb[0].mxu1 %vm487_vm11, %v478_v38  ;;  %v157_v38 = vmul.f32 %v1219_v19, %v1219_v19 }
 0x272   :  { %v561_v59 = vpop.f32.mrb[0].mxu1 }
 0x273   :  { %v562_v61 = vadd.f32 %v964_v16, %v561_v59  ;;  %v1005_v62 = vpop.f32.mrb[1].mxu1  ;;  %v199_v16 = vadd.f32 %v157_v38, %v156_v56  ;;  %v158_v59 = vmul.f32 %v1229_v24, %v1229_v24  ;;  %v174_v56 = vpop.xlane.xlu1 %173 }
 0x274   :  { %v160_v62 = vmul.f32 %v1241_v30, %v1241_v30 }
 0x275   :  { %v566_v39 = vsel %vm565_vm12, %v562_v61, -inf  ;;  %v202_v26 = vadd.f32 %v159_v0, %v158_v59 }
 0x276   :  { %567 = vmax.xlane.f32.xlu0 %v566_v39  ;;  %v161_v39 = vmul.f32 %v1243_v31, %v1243_v31 }
 0x277   :  { %v177_v38 = vpop.xlane.xlu1 %176 }
 0x27a   :  { %170 = vadd.xlane.f32.xlu0 %v169_v50  ;;  %v205_v50 = vadd.f32 %v161_v39, %v160_v62  ;;  %v217_v62 = vmul.f32 0.00390625, %v177_v38  ;;  %v232_v39 = vmul.f32 %v1359_v52, %v1359_v52  ;;  %v236_v52 = vmul.f32 %v1394_v44, %v1394_v44 }
 0x27e   :  { %194 = vadd.xlane.f32.xlu0 %v193_v51  ;;  %v208_v51 = vadd.f32 %v163_v20, %v162_v58  ;;  %v233_v58 = vmul.f32 %v1363_v7, %v1363_v7  ;;  %v237_v7 = vmul.f32 %v1418_v55, %v1418_v55 }
 0x282   :  { %197 = vadd.xlane.f32.xlu0 %v196_v21  ;;  %v211_v21 = vadd.f32 %v165_v1, %v164_v28 }
 0x286   :  { %200 = vadd.xlane.f32.xlu0 %v199_v16  ;;  %v180_v16 = vpop.xlane.xlu1 %179 }
 0x28a   :  { %203 = vadd.xlane.f32.xlu0 %v202_v26  ;;  %v183_v59 = vpop.xlane.xlu1 %182  ;;  %v216_v26 = vmul.f32 0.00390625, %v174_v56 }
 0x28b   :  { %v219_v1 = vmul.f32 0.00390625, %v183_v59 }
 0x28c   :  { %v248_v28 = vsub.f32 %v216_v26, %v232_v39 }
 0x28d   :  { %v251_v37 = vsub.f32 %v219_v1, %v235_v27  ;;  %v239_v27 = vmul.f32 %v1344_v40, %v1344_v40 }
 0x28e   :  { %206 = vadd.xlane.f32.xlu0 %v205_v50  ;;  %v186_v0 = vpop.xlane.xlu1 %185  ;;  %v218_v50 = vmul.f32 0.00390625, %v180_v16  ;;  %v264_v42 = vmax.f32 %v248_v28, 0.0 }
 0x28f   :  { %v220_v45 = vmul.f32 0.00390625, %v186_v0 }
 0x291   :  { %v252_v26 = vsub.f32 %v220_v45, %v236_v52  ;;  %v240_v52 = vmul.f32 %v1354_v48, %v1354_v48 }
 0x292   :  { %209 = vadd.xlane.f32.xlu0 %v208_v51  ;;  %v189_v20 = vpop.xlane.xlu1 %188  ;;  %v234_v51 = vmul.f32 %v1372_v11, %v1372_v11 }
 0x293   :  { %v221_v38 = vmul.f32 0.00390625, %v189_v20  ;;  %v267_v20 = vmax.f32 %v251_v37, 0.0 }
 0x294   :  { %v250_v56 = vsub.f32 %v218_v50, %v234_v51 }
 0x295   :  { %v253_v0 = vsub.f32 %v221_v38, %v237_v7 }
 0x296   :  { %212 = vadd.xlane.f32.xlu0 %v211_v21  ;;  %v249_v21 = vsub.f32 %v217_v62, %v233_v58  ;;  %v266_v62 = vmax.f32 %v250_v56, 0.0  ;;  %v579_v58 = vadd.f32 1e-05, %v264_v42 }
 0x297   :  { %v269_v55 = vmax.f32 %v253_v0, 0.0  ;;  %v241_v0 = vmul.f32 %v1361_v53, %v1361_v53 }
 0x298   :  { %v265_v11 = vmax.f32 %v249_v21, 0.0  ;;  %v581_v51 = vadd.f32 1e-05, %v266_v62  ;;  %v582_v21 = vadd.f32 1e-05, %v267_v20 }
 0x299   :  { %v584_v42 = vadd.f32 1e-05, %v269_v55 }
 0x29a   :  { %v580_v44 = vadd.f32 1e-05, %v265_v11 }
 0x303   :  { %v568_v43 = vpop.xlane.xlu0 %567 }
 0x304   :  { %v569_v16 = vsub.f32 %v562_v61, %v568_v43  ;;  %v268_v43 = vmax.f32 %v252_v26, 0.0 }
 0x306   :  { %v570_v59 = vmul.f32 1.442695, %v569_v16  ;;  %v583_v56 = vadd.f32 1e-05, %v268_v43  ;;  %v242_v43 = vmul.f32 %v1365_v10, %v1365_v10 }
 0x307   :  { %v171_v39 = vpop.xlane.xlu0 %170 }
 0x308   :  { %1030 = vpow2.f32 %v570_v59  ;;  %v215_v50 = vmul.f32 0.00390625, %v171_v39 }
 0x309   :  { %1032 = vrsqrt.f32 %v579_v58 }
 0x30a   :  { %v247_v61 = vsub.f32 %v215_v50, %v231_v3  ;;  %1034 = vrsqrt.f32 %v580_v44 }
 0x30b   :  { %v195_v28 = vpop.xlane.xlu0 %194  ;;  %1036 = vrsqrt.f32 %v581_v51 }
 0x30c   :  { %v263_v45 = vmax.f32 %v247_v61, 0.0  ;;  %v223_v1 = vmul.f32 0.00390625, %v195_v28 }
 0x30e   :  { %v578_v47 = vadd.f32 1e-05, %v263_v45  ;;  %v255_v38 = vsub.f32 %v223_v1, %v239_v27  ;;  %v243_v1 = vmul.f32 %v1374_v54, %v1374_v54 }
 0x30f   :  { %v198_v37 = vpop.xlane.xlu0 %197 }
 0x310   :  { %1038 = vrsqrt.f32 %v578_v47  ;;  %v271_v16 = vmax.f32 %v255_v38, 0.0  ;;  %v224_v7 = vmul.f32 0.00390625, %v198_v37 }
 0x311   :  { %1040 = vrsqrt.f32 %v582_v21 }
 0x312   :  { %v1503_v11 = vpop.eup %1030  ;;  %1042 = vrsqrt.f32 %v583_v56  ;;  %v586_v40 = vadd.f32 1e-05, %v271_v16  ;;  %v256_v26 = vsub.f32 %v224_v7, %v240_v52  ;;  %v244_v52 = vmul.f32 %v1387_v35, %v1387_v35 }
 0x313   :  { %1044 = vrsqrt.f32 %v584_v42  ;;  %v201_v59 = vpop.xlane.xlu0 %200  ;;  %v572_v62 = vsel %vm565_vm12, %v1503_v11, 0.0  ;;  %v1033_v58 = vpop.eup %1032  ;;  %v1651_v7 = vrot.slane %v1435_v32, %v1336_v23 }
 0x314   :  { %1046 = vrsqrt.f32 %v586_v40  ;;  %v272_v39 = vmax.f32 %v256_v26, 0.0  ;;  %v225_v48 = vmul.f32 0.00390625, %v201_v59  ;;  %573 = vadd.xlane.f32.xlu1 %v572_v62  ;;  %v1035_v44 = vpop.eup %1034  ;;  %v637_v38 = vrot.slane %v1033_v58, %v1342_v34 }
 0x315   :  { %v1037_v55 = vpop.eup %1036  ;;  %v642_v16 = vrot.slane %v1035_v44, %v1347_v41 }
 0x316   :  { %v587_v3 = vadd.f32 1e-05, %v272_v39  ;;  %v257_v50 = vsub.f32 %v225_v48, %v241_v0  ;;  %v647_v26 = vrot.slane %v1037_v55, %v1350_v46 }
 0x317   :  { %v204_v20 = vpop.xlane.xlu0 %203 }
 0x318   :  { %1048 = vrsqrt.f32 %v587_v3  ;;  %v273_v61 = vmax.f32 %v257_v50, 0.0  ;;  %v226_v51 = vmul.f32 0.00390625, %v204_v20 }
 0x31a   :  { %v1039_v28 = vpop.eup %1038  ;;  %v588_v27 = vadd.f32 1e-05, %v273_v61  ;;  %v258_v45 = vsub.f32 %v226_v51, %v242_v43  ;;  %v1652_v43 = vrot.slane %v1439_v22, %v1336_v23 }
 0x31b   :  { %v1041_v53 = vpop.eup %1040  ;;  %v632_v21 = vrot.slane %v1039_v28, %v1339_v29  ;;  %v207_v56 = vpop.xlane.xlu0 %206 }
 0x31c   :  { %v1043_v47 = vpop.eup %1042  ;;  %1050 = vrsqrt.f32 %v588_v27  ;;  %v274_v42 = vmax.f32 %v258_v45, 0.0  ;;  %v227_v10 = vmul.f32 0.00390625, %v207_v56  ;;  %v652_v39 = vrot.slane %v1041_v53, %v1357_v49 }
 0x31d   :  { %v1045_v37 = vpop.eup %1044  ;;  %v633_v54 = vsel %vm320_vm1, %v632_v21, %v1651_v7  ;;  %v657_v48 = vrot.slane %v1043_v47, %v1368_v57  ;;  %v245_v21 = vmul.f32 %v1414_v60, %v1414_v60 }
 0x31e   :  { %v1047_v40 = vpop.eup %1046  ;;  %v638_v59 = vsel %vm327_vm2, %v637_v38, %v633_v54  ;;  %v589_v62 = vadd.f32 1e-05, %v274_v42  ;;  %v259_v0 = vsub.f32 %v227_v10, %v243_v1  ;;  %v662_v44 = vrot.slane %v1045_v37, %v1402_v33 }
 0x31f   :  { %v643_v35 = vsel %vm334_vm3, %v642_v16, %v638_v59  ;;  %v671_v3 = vrot.slane %v1047_v40, %v1339_v29  ;;  %v210_v50 = vpop.xlane.xlu0 %209 }
 0x320   :  { %1052 = vrsqrt.f32 %v589_v62  ;;  %v275_v32 = vmax.f32 %v259_v0, 0.0  ;;  %v228_v58 = vmul.f32 0.00390625, %v210_v50  ;;  %v648_v20 = vsel %vm341_vm4, %v647_v26, %v643_v35 }
 0x321   :  { %v672_v61 = vsel %vm320_vm1, %v671_v3, %v1652_v43  ;;  %v653_v51 = vsel %vm348_vm5, %v652_v39, %v648_v20  ;;  %v749_v50 = vsub.s32 1, %v1333_v63 }
 0x322   :  { %v1049_v55 = vpop.eup %1048  ;;  %v590_v28 = vadd.f32 1e-05, %v275_v32  ;;  %v260_v27 = vsub.f32 %v228_v58, %v244_v52  ;;  %v658_v29 = vsel %vm355_vm6, %v657_v48, %v653_v51  ;;  %v714_v58 = vsub.s32 0, %v1333_v63 }
 0x323   :  { %v676_v45 = vrot.slane %v1049_v55, %v1342_v34  ;;  %v213_v53 = vpop.xlane.xlu0 %212  ;;  %v663_v1 = vsel %vm362_vm7, %v662_v44, %v658_v29 }
 0x324   :  { %1054 = vrsqrt.f32 %v590_v28  ;;  %v276_v56 = vmax.f32 %v260_v27, 0.0  ;;  %v229_v23 = vmul.f32 0.00390625, %v213_v53 }
 0x325   :  { %v677_v22 = vsel %vm327_vm2, %v676_v45, %v672_v61 }
 0x326   :  { %v1051_v47 = vpop.eup %1050  ;;  %v591_v38 = vadd.f32 1e-05, %v276_v56  ;;  %v261_v42 = vsub.f32 %v229_v23, %v245_v21 }
 0x327   :  { %v681_v10 = vrot.slane %v1051_v47, %v1347_v41 }
 0x328   :  { %1056 = vrsqrt.f32 %v591_v38  ;;  %v277_v37 = vmax.f32 %v261_v42, 0.0 }
 0x329   :  { %v682_v34 = vsel %vm334_vm3, %v681_v10, %v677_v22 }
 0x32a   :  { %v1053_v52 = vpop.eup %1052  ;;  %v592_v16 = vadd.f32 1e-05, %v277_v37 }
 0x32b   :  { %v686_v7 = vrot.slane %v1053_v52, %v1350_v46 }
 0x32c   :  { %1058 = vrsqrt.f32 %v592_v16  ;;  %v1654_v16 = vld [vmem:[#allocation10_spill] sm:$0xff] }
 0x32d   :  { %v687_v60 = vsel %vm341_vm4, %v686_v7, %v682_v34  ;;  %v1653_v34 = vld [vmem:[#allocation9_spill] sm:$0xff] }
 0x32e   :  { %v1055_v54 = vpop.eup %1054 }
 0x32f   :  { %v691_v40 = vrot.slane %v1055_v54, %v1357_v49  ;;  %v1655_v54 = vld [vmem:[#allocation11_spill] sm:$0xff] }
 0x331   :  { %v692_v26 = vsel %vm348_vm5, %v691_v40, %v687_v60  ;;  %v1656_v40 = vld [vmem:[#allocation12_spill] sm:$0xff] }
 0x332   :  { %v1057_v59 = vpop.eup %1056 }
 0x333   :  { %v696_v62 = vrot.slane %v1057_v59, %v1368_v57 }
 0x335   :  { %v697_v41 = vsel %vm355_vm6, %v696_v62, %v692_v26  ;;  %v1657_v62 = vld [vmem:[#allocation13_spill] sm:$0xff] }
 0x336   :  { %v1059_v0 = vpop.eup %1058 }
 0x337   :  { %v701_v39 = vrot.slane %v1059_v0, %v1402_v33 }
 0x339   :  { %v702_v48 = vsel %vm362_vm7, %v701_v39, %v697_v41  ;;  %v1658_v41 = vld [vmem:[#allocation14_spill] sm:$0xff] }
 0x33a   :  { %v703_v46 = vsel %vm403_vm8, %v702_v48, %v663_v1 }
 0x3a1   :  { %v574_v35 = vpop.xlane.xlu1 %573 }
 0x3a2   :  { %1060 = vrcp.f32 %v574_v35 }
 0x3ac   :  { %v1061_v3 = vpop.eup %1060 }
 0x3ad   :  { %v576_v49 = vmul.f32 %v1061_v3, %v1503_v11 }
 0x3af   :  { %v705_v32 = vmul.f32 %v703_v46, %v576_v49 }
 0x3b1   :  { %v750_v57 = vrot.slane %v705_v32, %v749_v50  ;;  %v715_v33 = vrot.slane %v705_v32, %v714_v58  ;;  %v707_v11 = vmul.f32 %v705_v32, %v1432_v17  ;;  %v1659_v32 = vld [vmem:[#allocation15_spill] sm:$0xff] }
 0x3b3   :  { %756 = vbcast.lane.b32.xlu1 %v750_v57, 264  ;;  %752 = vbcast.lane.b32.xlu0 %v750_v57, 256  ;;  %v708_v20 = vsel %vm565_vm12, %v707_v11, 0.0 }
 0x3b7   :  { %760 = vbcast.lane.b32.xlu0 %v750_v57, 272  ;;  %717 = vbcast.lane.b32.xlu1 %v715_v33, 256 }
 0x3bb   :  { %764 = vbcast.lane.b32.xlu0 %v750_v57, 280  ;;  %721 = vbcast.lane.b32.xlu1 %v715_v33, 264 }
 0x3bf   :  { %768 = vbcast.lane.b32.xlu0 %v750_v57, 288  ;;  %725 = vbcast.lane.b32.xlu1 %v715_v33, 272 }
 0x3c3   :  { %772 = vbcast.lane.b32.xlu0 %v750_v57, 296  ;;  %729 = vbcast.lane.b32.xlu1 %v715_v33, 280 }
 0x3c7   :  { %776 = vbcast.lane.b32.xlu0 %v750_v57, 304  ;;  %733 = vbcast.lane.b32.xlu1 %v715_v33, 288 }
 0x3cb   :  { %741 = vbcast.lane.b32.xlu0 %v715_v33, 304  ;;  %737 = vbcast.lane.b32.xlu1 %v715_v33, 296 }
 0x3cf   :  { %780 = vbcast.lane.b32.xlu0 %v750_v57, 312  ;;  %v1660_v57 = vld [vmem:[#allocation16_spill] sm:$0xff] }
 0x3d3   :  { %745 = vbcast.lane.b32.xlu0 %v715_v33, 312 }
 0x3ef   :  { %709 = vadd.xlane.f32.xlu1 %v708_v20 }
 0x425   :  { %v753_v44 = vpop.permute.xlu0 %752  ;;  %v757_v43 = vpop.permute.xlu1 %756 }
 0x426   :  { %v800_v10 = vmul.f32 %v757_v43, %v1191_v5  ;;  %v801_v37 = vmul.f32 %v757_v43, %v1193_v6  ;;  %v798_v52 = vmul.f32 %v753_v44, %v1653_v34  ;;  %v799_v7 = vmul.f32 %v753_v44, %v1654_v16 }
 0x428   :  { %v840_v39 = vadd.f32 %v800_v10, %v798_v52  ;;  %v853_v48 = vadd.f32 %v801_v37, %v799_v7  ;;  %v1665_v37 = vld [vmem:[#allocation23_spill] sm:$0xff]  ;;  %v1666_v52 = vld [vmem:[#allocation20_spill] sm:$0xff] }
 0x429   :  { %v761_v61 = vpop.permute.xlu0 %760  ;;  %v718_v51 = vpop.permute.xlu1 %717 }
 0x42a   :  { %v782_v22 = vmul.f32 %v718_v51, %v1185_v2  ;;  %v783_v47 = vmul.f32 %v718_v51, %v1189_v4  ;;  %v802_v4 = vmul.f32 %v761_v61, %v1205_v12 }
 0x42c   :  { %v841_v33 = vadd.f32 %v840_v39, %v802_v4 }
 0x42d   :  { %v765_v55 = vpop.permute.xlu0 %764  ;;  %v722_v28 = vpop.permute.xlu1 %721 }
 0x42e   :  { %v784_v23 = vmul.f32 %v722_v28, %v1197_v8  ;;  %v785_v17 = vmul.f32 %v722_v28, %v1199_v9  ;;  %v804_v46 = vmul.f32 %v765_v55, %v1217_v18  ;;  %v805_v35 = vmul.f32 %v765_v55, %v1219_v19 }
 0x430   :  { %v814_v60 = vadd.f32 %v784_v23, %v782_v22  ;;  %v827_v8 = vadd.f32 %v785_v17, %v783_v47  ;;  %v842_v51 = vadd.f32 %v841_v33, %v804_v46  ;;  %v1661_v22 = vld [vmem:[#allocation17_spill] sm:$0xff] }
 0x431   :  { %v769_v27 = vpop.permute.xlu0 %768  ;;  %v726_v29 = vpop.permute.xlu1 %725 }
 0x432   :  { %v786_v38 = vmul.f32 %v726_v29, %v1209_v14  ;;  %v787_v42 = vmul.f32 %v726_v29, %v1211_v15  ;;  %v803_v14 = vmul.f32 %v761_v61, %v1207_v13  ;;  %v806_v20 = vmul.f32 %v769_v27, %v1229_v24  ;;  %v1662_v24 = vld [vmem:[#allocation18_spill] sm:$0xff] }
 0x433   :  { %v807_v44 = vmul.f32 %v769_v27, %v1231_v25  ;;  %v1663_v25 = vld [vmem:[#allocation19_spill] sm:$0xff] }
 0x434   :  { %v815_v59 = vadd.f32 %v814_v60, %v786_v38  ;;  %v828_v5 = vadd.f32 %v827_v8, %v787_v42  ;;  %v854_v11 = vadd.f32 %v853_v48, %v803_v14  ;;  %v1664_v42 = vld [vmem:[#allocation22_spill] sm:$0xff] }
 0x435   :  { %v773_v45 = vpop.permute.xlu0 %772  ;;  %v730_v53 = vpop.permute.xlu1 %729 }
 0x436   :  { %v788_v9 = vmul.f32 %v730_v53, %v1655_v54  ;;  %v789_v2 = vmul.f32 %v730_v53, %v1656_v40  ;;  %v855_v28 = vadd.f32 %v854_v11, %v805_v35  ;;  %v808_v18 = vmul.f32 %v773_v45, %v1241_v30 }
 0x437   :  { %v809_v19 = vmul.f32 %v773_v45, %v1243_v31  ;;  %v1667_v45 = vld [vmem:[#allocation21_spill] sm:$0xff] }
 0x438   :  { %v816_v3 = vadd.f32 %v815_v59, %v788_v9  ;;  %v829_v49 = vadd.f32 %v828_v5, %v789_v2  ;;  %v856_v23 = vadd.f32 %v855_v28, %v807_v44 }
 0x439   :  { %v777_v1 = vpop.permute.xlu0 %776  ;;  %v734_v21 = vpop.permute.xlu1 %733 }
 0x43a   :  { %v790_v6 = vmul.f32 %v734_v21, %v1657_v62  ;;  %v791_v0 = vmul.f32 %v734_v21, %v1658_v41  ;;  %v843_v21 = vadd.f32 %v842_v51, %v806_v20  ;;  %v810_v17 = vmul.f32 %v777_v1, %v1253_v36 }
 0x43b   :  { %v811_v47 = vmul.f32 %v777_v1, %v1661_v22  ;;  %v857_v31 = vadd.f32 %v856_v23, %v809_v19 }
 0x43c   :  { %v817_v43 = vadd.f32 %v816_v3, %v790_v6  ;;  %v830_v61 = vadd.f32 %v829_v49, %v791_v0  ;;  %v844_v30 = vadd.f32 %v843_v21, %v808_v18 }
 0x43d   :  { %v742_v56 = vpop.permute.xlu0 %741  ;;  %v738_v26 = vpop.permute.xlu1 %737  ;;  %v858_v36 = vadd.f32 %v857_v31, %v811_v47 }
 0x43e   :  { %v792_v12 = vmul.f32 %v738_v26, %v1659_v32  ;;  %v793_v13 = vmul.f32 %v738_v26, %v1660_v57  ;;  %v794_v38 = vmul.f32 %v742_v56, %v1662_v24  ;;  %v795_v27 = vmul.f32 %v742_v56, %v1663_v25 }
 0x43f   :  { %v845_v54 = vadd.f32 %v844_v30, %v810_v17  ;;  %v1132_v30 = vmov 1983009808  }
 0x440   :  { %v818_v55 = vadd.f32 %v817_v43, %v792_v12  ;;  %v831_v53 = vadd.f32 %v830_v61, %v793_v13  ;;  %v711_v12 = vld [vmem:[%s1615_s1] sm:$0x3]  ;;  %s1133_s1 = smov [#allocation6]  }
 0x441   :  { %v781_v15 = vpop.permute.xlu0 %780  ;;  %v878_v20 = vrot.slane %v711_v12, %v714_v58  ;;  %v882_v44 = vrot.slane %v711_v12, %v749_v50  ;;  %s953_s5 = sshll.u32 %s1133_s1, 4  ;;  %s954_s5 = int_to_ptr.vmem [resolvable:$true] %s953_s5 }
 0x442   :  { %v812_v16 = vmul.f32 %v781_v15, %v1666_v52  ;;  %v813_v7 = vmul.f32 %v781_v15, %v1667_v45  ;;  %v819_v60 = vadd.f32 %v818_v55, %v794_v38  ;;  %v832_v8 = vadd.f32 %v831_v53, %v795_v27  ;;  %s1100_s7 = scalar_lea.vmem %s954_s5, 64  ;;  %p1105_p9 = scmp.lt.s32.totalorder %s954_s5, %s954_s5 }
 0x443   :  { %v919_v52 = vunpack.c.l.s4 %v1132_v30  ;;  %p1101_p8 = scmp.ne.s32.totalorder %s954_s5, %s1100_s7  ;;  %p1106_p10 = scmp.lt.s32.totalorder %s1100_s7, %s1100_s7 }
 0x444   :  { %v846_v40 = vadd.f32 %v845_v54, %v812_v16  ;;  %v859_v2 = vadd.f32 %v858_v36, %v813_v7 }
 0x445   :  { %v746_v29 = vpop.permute.xlu0 %745  ;;  %v920_v31 = vunpack.c.0.s8 %v919_v52  ;;  %p1107_p11 = por %p1106_p10, %p1105_p9 }
 0x446   :  { %v796_v10 = vmul.f32 %v746_v29, %v1664_v42  ;;  %v797_v34 = vmul.f32 %v746_v29, %v1665_v37  ;;  %v847_v14 = vrot.slane %v846_v40, 4  ;;  %v860_v26 = vrot.slane %v859_v2, 4 }
 0x447   :  { %v923_v54 = vsub.s32 %v920_v31, %v1333_v63  ;;  %p1108_p12 = pnand %p1107_p11, %p1101_p8 }
 0x448   :  { %v820_v9 = vadd.f32 %v819_v60, %v796_v10  ;;  %v833_v1 = vadd.f32 %v832_v8, %v797_v34  ;;  %v848_v62 = vadd.f32 %v847_v14, %v846_v40  ;;  %v861_v6 = vadd.f32 %v860_v26, %v859_v2 }
 0x44a   :  { %v821_v4 = vrot.slane %v820_v9, 4  ;;  %v834_v56 = vrot.slane %v833_v1, 4  ;;  %v849_v39 = vrot.slane %v848_v62, 2  ;;  %v862_v15 = vrot.slane %v861_v6, 2 }
 0x44c   :  { %v822_v59 = vadd.f32 %v821_v4, %v820_v9  ;;  %v835_v5 = vadd.f32 %v834_v56, %v833_v1  ;;  %v850_v35 = vadd.f32 %v849_v39, %v848_v62  ;;  %v863_v3 = vadd.f32 %v862_v15, %v861_v6 }
 0x44e   :  { %v823_v41 = vrot.slane %v822_v59, 2  ;;  %v836_v0 = vrot.slane %v835_v5, 2  ;;  %v851_v57 = vrot.slane %v850_v35, 1  ;;  %v864_v13 = vrot.slane %v863_v3, 1 }
 0x450   :  { %v824_v48 = vadd.f32 %v823_v41, %v822_v59  ;;  %v837_v46 = vadd.f32 %v836_v0, %v835_v5  ;;  %v852_v43 = vadd.f32 %v851_v57, %v850_v35  ;;  %v865_v51 = vadd.f32 %v864_v13, %v863_v3 }
 0x452   :  { %v825_v49 = vrot.slane %v824_v48, 1  ;;  %v838_v32 = vrot.slane %v837_v46, 1 }
 0x454   :  { %v826_v33 = vadd.f32 %v825_v49, %v824_v48  ;;  %v839_v11 = vadd.f32 %v838_v32, %v837_v46 }
 0x47c   :  { %v710_v61 = vpop.xlane.xlu1 %709 }
 0x47d   :  { %v867_v28 = vrot.slane %v710_v61, 1  ;;  %v870_v18 = vsub.f32 %v826_v33, %v710_v61  ;;  %v871_v29 = vsub.f32 %v839_v11, %v710_v61 }
 0x47f   :  { %v872_v19 = vsub.f32 %v852_v43, %v867_v28  ;;  %v873_v55 = vsub.f32 %v865_v51, %v867_v28  ;;  %v885_v53 = vmul.f32 %v878_v20, %v870_v18  ;;  %v886_v21 = vmul.f32 %v882_v44, %v871_v29 }
 0x481   :  { %v887_v23 = vmul.f32 %v878_v20, %v872_v19  ;;  %v888_v17 = vmul.f32 %v882_v44, %v873_v55  ;;  %v967_v22 = vmul.f32 -1.442695, %v885_v53  ;;  %v968_v47 = vmul.f32 -1.442695, %v886_v21 }
 0x483   :  { %1062 = vpow2.f32 %v967_v22  ;;  %v969_v24 = vmul.f32 -1.442695, %v887_v23  ;;  %v970_v58 = vmul.f32 -1.442695, %v888_v17 }
 0x484   :  { %1064 = vpow2.f32 %v968_v47 }
 0x485   :  { %1066 = vpow2.f32 %v969_v24 }
 0x486   :  { %1068 = vpow2.f32 %v970_v58 }
 0x48d   :  { %v1063_v50 = vpop.eup %1062 }
 0x48e   :  { %v1065_v38 = vpop.eup %1064  ;;  %v901_v25 = vadd.f32 1.0, %v1063_v50 }
 0x48f   :  { %v1067_v27 = vpop.eup %1066  ;;  %v902_v42 = vadd.f32 1.0, %v1065_v38 }
 0x490   :  { %v1069_v10 = vpop.eup %1068  ;;  %v903_v37 = vadd.f32 1.0, %v1067_v27  ;;  %1070 = vrcp.f32 %v901_v25 }
 0x491   :  { %v904_v34 = vadd.f32 1.0, %v1069_v10  ;;  %1072 = vrcp.f32 %v902_v42 }
 0x492   :  { %1074 = vrcp.f32 %v903_v37 }
 0x493   :  { %1076 = vrcp.f32 %v904_v34 }
 0x49a   :  { %v1071_v16 = vpop.eup %1070 }
 0x49b   :  { %v1073_v45 = vpop.eup %1072 }
 0x49c   :  { %v1075_v7 = vpop.eup %1074  ;;  %v917_v60 = vcombine.low %v1071_v16, %v1073_v45 }
 0x49d   :  { %v1077_v8 = vpop.eup %1076 }
 0x49e   :  { %v925_v36 = vcombine.low %v1075_v7, %v1077_v8  ;;  %v924_v1 = vrot.slane %v917_v60, %v923_v54 }
 0x4a0   :  { %v932_v9 = vrot.slane %v925_v36, %v923_v54 }
 0x4a2   :  { %v937_v40 = vrot.slane %v932_v9, 7 }
 0x4a4   :  { %v938_v2 = vsel %vm403_vm8, %v937_v40, %v924_v1 }
 0x4a5   :  { %v940_v4 = vsel %vm939_vm13, %v937_v40, %v938_v2 }
 0x4a6   :  { %v942_v56 = vsel %vm941_vm14, %v937_v40, %v940_v4 }
 0x4a7   :  { %v944_v14 = vsel %vm943_vm15, %v937_v40, %v942_v56 }
 0x4a8   :  { %946 = vst [vmem:[#allocation6] sm:$0xf] %v944_v14 }
 0x4a9   :  { %1111 = shalt.err (!%p1108_p12)
}
 0x4aa   :  { %s1112_s10 = scalar_lea.hbm %s1620_s6, 64 }
 0x4ab   :  { %p1113_p13 = scmp.ne.s32.totalorder %s1620_s6, %s1112_s10  ;;  %p1116_p0 = scmp.lt.u32.totalorder %s1112_s10, %s1620_s6 }
 0x4ad   :  { %p1118_p1 = pnand %p1116_p0, %p1113_p13 }
 0x4af   :  { %1121 = shalt.err (!%p1118_p1)
}
 0x4b0   :  { %956 = dma.vmem_to_hbm [thread:$0]  %s954_s5, 64, %s1620_s6, [#allocation5]  }
 0x4b1   :  { %1124 = dma.done.wait [#allocation5], 64  }
 0x4b2   :  { %1125 = vsyncadd [#allocation5], 4294967232 }
 0x4b3   :  { %960 = vsyncpa [#allocation4], 1 }
 0x4b4   :  { %961 = vsyncpa [#allocation5], 1 }

// kernel: tpu_custom_call.1
= control target key start
LH: loop header
LB: loop body
LE: loop exit
PB: predicated region body
PF: predicated region fallthrough
CT: control target
= control target key end

     0   :  { %11 = vsyncpa [#allocation4], 0  ;;  %s1667_s0 = inlined_call_operand.hbm [shape: f32[2,64,256], index: 0, kind: input, shape index: {}]   ;;  %s1668_s1 = inlined_call_operand.vmem [shape: f32[1,256], index: 1, kind: input, shape index: {}]   ;;  %s1669_s2 = inlined_call_operand.vmem [shape: f32[64,4], index: 2, kind: input, shape index: {}]   ;;  %s1670_s3 = inlined_call_operand.vmem [shape: f32[1,4], index: 3, kind: input, shape index: {}]   ;;  %s1671_s4 = inlined_call_operand.vmem [shape: f32[4,64], index: 4, kind: input, shape index: {}]   ;;  %s1672_s5 = inlined_call_operand.vmem [shape: f32[1,64], index: 5, kind: input, shape index: {}]   ;;  %s1673_s6 = inlined_call_operand.hbm [shape: f32[2,256], index: 6, kind: output, shape index: {}]  }
   0x1   :  { %12 = vsyncpa [#allocation5], 0  ;;  %s1173_s21 = smov [#allocation3]   ;;  %s1125_s25 = scalar_lea.hbm %s1667_s0, 4096 }
   0x2   :  { %s18_s22 = sshll.u32 %s1173_s21, 4  ;;  %p1126_p0 = scmp.ne.s32.totalorder %s1667_s0, %s1125_s25  ;;  %s19_s22 = int_to_ptr.vmem [resolvable:$true] %s18_s22 }
   0x3   :  { %p1129_p1 = scmp.lt.u32.totalorder %s1125_s25, %s1667_s0 }
   0x5   :  { %p1131_p2 = pnand %p1129_p1, %p1126_p0 }
   0x7   :  { %1134 = shalt.err (!%p1131_p2)
}
   0x8   :  { %s1135_s30 = scalar_lea.vmem %s19_s22, 4096  ;;  %p1140_p4 = scmp.lt.s32.totalorder %s19_s22, %s19_s22 }
   0x9   :  { %p1136_p3 = scmp.ne.s32.totalorder %s19_s22, %s1135_s30  ;;  %p1141_p5 = scmp.lt.s32.totalorder %s1135_s30, %s1135_s30 }
   0xb   :  { %p1142_p6 = por %p1141_p5, %p1140_p4 }
   0xd   :  { %p1143_p7 = pnand %p1142_p6, %p1136_p3 }
   0xf   :  { %1146 = shalt.err (!%p1143_p7)
}
  0x10   :  { %s1174_s7 = smov 256   ;;  %s1175_s8 = smov 16  }
  0x11   :  { %24 = dma.hbm_to_vmem [thread:$0]  %s1667_s0, 4096, %s19_s22, [#allocation4], %s1174_s7, %s1174_s7, %s1175_s8  }
  0x12   :  { %1169 = dma.done.wait [#allocation4], 4096  }
  0x13   :  { %1170 = vsyncadd [#allocation4], 4294963200  ;;  %v1230_v0 = vld [vmem:[#allocation3 + $0x80] sm:$0xff]  ;;  %v1232_v1 = vld [vmem:[#allocation3 + $0x88] sm:$0xff]  ;;  %v1176_v59 = vmov 0.0|0.0   ;;  %vm1177_vm0 = vmmov 0  }
  0x14   :  { %v1234_v2 = vld [vmem:[#allocation3] sm:$0xff]  ;;  %v94_v3 = vadd.f32 %v1232_v1, %v1230_v0  ;;  %v1238_v4 = vld [vmem:[#allocation3 + $0x8] sm:$0xff]  ;;  %v1240_v5 = vld [vmem:[#allocation3 + $0x90] sm:$0xff]  ;;  %v150_v50 = vmul.f32 %v1230_v0, %v1230_v0  ;;  %v151_v51 = vmul.f32 %v1232_v1, %v1232_v1  ;;  %1031 = vmatprep.subr.bf16.mxu0 %v1176_v59  ;;  %vm320_vm1 = vcmask 130112  }
  0x15   :  { %v1242_v6 = vld [vmem:[#allocation3 + $0x98] sm:$0xff]  ;;  %v70_v7 = vadd.f32 %v1238_v4, %v1234_v2  ;;  %v1246_v8 = vld [vmem:[#allocation3 + $0x10] sm:$0xff]  ;;  %v1254_v12 = vld [vmem:[#allocation3 + $0xa0] sm:$0xff]  ;;  %v134_v46 = vmul.f32 %v1234_v2, %v1234_v2  ;;  %v135_v47 = vmul.f32 %v1238_v4, %v1238_v4  ;;  %vm327_vm2 = vcmask 195712  }
  0x16   :  { %v1248_v9 = vld [vmem:[#allocation3 + $0x18] sm:$0xff]  ;;  %95 = vadd.xlane.f32.xlu1 %v94_v3  ;;  %v97_v10 = vadd.f32 %v1242_v6, %v1240_v5  ;;  %v1256_v13 = vld [vmem:[#allocation3 + $0xa8] sm:$0xff]  ;;  %v1258_v14 = vld [vmem:[#allocation3 + $0x20] sm:$0xff]  ;;  %v190_v53 = vadd.f32 %v151_v51, %v150_v50  ;;  %vm334_vm3 = vcmask 261312   ;;  %vm341_vm4 = vcmask 326912  }
  0x17   :  { %71 = vadd.xlane.f32.xlu0 %v70_v7  ;;  %v73_v11 = vadd.f32 %v1248_v9, %v1246_v8  ;;  %1691 = vst [vmem:[#allocation9_spill] sm:$0xff] %v1258_v14  ;;  %v1260_v15 = vld [vmem:[#allocation3 + $0x28] sm:$0xff]  ;;  %v100_v16 = vadd.f32 %v1256_v13, %v1254_v12  ;;  %v1266_v18 = vld [vmem:[#allocation3 + $0xb0] sm:$0xff]  ;;  %v1268_v19 = vld [vmem:[#allocation3 + $0xb8] sm:$0xff]  ;;  %v166_v52 = vadd.f32 %v135_v47, %v134_v46  ;;  %vm348_vm5 = vcmask 392512  }
  0x18   :  { %v76_v17 = vadd.f32 %v1260_v15, %v1258_v14  ;;  %v1270_v20 = vld [vmem:[#allocation3 + $0x30] sm:$0xff]  ;;  %v1272_v21 = vld [vmem:[#allocation3 + $0x38] sm:$0xff]  ;;  %v103_v22 = vadd.f32 %v1268_v19, %v1266_v18  ;;  %v1278_v24 = vld [vmem:[#allocation3 + $0xc0] sm:$0xff]  ;;  %v138_v56 = vmul.f32 %v1258_v14, %v1258_v14  ;;  %v139_v57 = vmul.f32 %v1260_v15, %v1260_v15 }
  0x19   :  { %1692 = vst [vmem:[#allocation10_spill] sm:$0xff] %v1270_v20  ;;  %1693 = vst [vmem:[#allocation11_spill] sm:$0xff] %v1272_v21  ;;  %v79_v23 = vadd.f32 %v1272_v21, %v1270_v20  ;;  %v1280_v25 = vld [vmem:[#allocation3 + $0xc8] sm:$0xff]  ;;  %v1282_v26 = vld [vmem:[#allocation3 + $0x40] sm:$0xff]  ;;  %v140_v63 = vmul.f32 %v1270_v20, %v1270_v20  ;;  %v141_v3 = vmul.f32 %v1272_v21, %v1272_v21  ;;  %vm355_vm6 = vcmask 458112  }
  0x1a   :  { %98 = vadd.xlane.f32.xlu1 %v97_v10  ;;  %1694 = vst [vmem:[#allocation12_spill] sm:$0xff] %v1282_v26  ;;  %v1284_v27 = vld [vmem:[#allocation3 + $0x48] sm:$0xff]  ;;  %v106_v28 = vadd.f32 %v1280_v25, %v1278_v24  ;;  %v1290_v30 = vld [vmem:[#allocation3 + $0xd0] sm:$0xff]  ;;  %v1292_v31 = vld [vmem:[#allocation3 + $0xd8] sm:$0xff]  ;;  %v172_v62 = vadd.f32 %v139_v57, %v138_v56  ;;  %vm362_vm7 = vcmask 523712   ;;  %vm403_vm8 = vcmask 1041409  }
  0x1b   :  { %74 = vadd.xlane.f32.xlu0 %v73_v11  ;;  %1695 = vst [vmem:[#allocation13_spill] sm:$0xff] %v1284_v27  ;;  %v82_v29 = vadd.f32 %v1284_v27, %v1282_v26  ;;  %v1294_v32 = vld [vmem:[#allocation3 + $0x50] sm:$0xff]  ;;  %v1296_v33 = vld [vmem:[#allocation3 + $0x58] sm:$0xff]  ;;  %v109_v34 = vadd.f32 %v1292_v31, %v1290_v30  ;;  %v1302_v36 = vld [vmem:[#allocation3 + $0xe0] sm:$0xff]  ;;  %vm405_vm9 = vcmask 523264   ;;  %vm491_vm10 = vcmask 1043456  }
  0x1c   :  { %1696 = vst [vmem:[#allocation14_spill] sm:$0xff] %v1294_v32  ;;  %1697 = vst [vmem:[#allocation15_spill] sm:$0xff] %v1296_v33  ;;  %v85_v35 = vadd.f32 %v1296_v33, %v1294_v32  ;;  %v1304_v37 = vld [vmem:[#allocation3 + $0xe8] sm:$0xff]  ;;  %v1306_v38 = vld [vmem:[#allocation3 + $0x60] sm:$0xff]  ;;  %vm487_vm11 = vcmask 31744   ;;  %vm565_vm12 = vcmask 517120  }
  0x1d   :  { %1698 = vst [vmem:[#allocation16_spill] sm:$0xff] %v1306_v38  ;;  %v1308_v39 = vld [vmem:[#allocation3 + $0x68] sm:$0xff]  ;;  %v112_v40 = vadd.f32 %v1304_v37, %v1302_v36  ;;  %v1314_v42 = vld [vmem:[#allocation3 + $0xf0] sm:$0xff]  ;;  %v1316_v43 = vld [vmem:[#allocation3 + $0xf8] sm:$0xff]  ;;  %v146_v47 = vmul.f32 %v1306_v38, %v1306_v38 }
  0x1e   :  { %101 = vadd.xlane.f32.xlu1 %v100_v16  ;;  %1699 = vst [vmem:[#allocation17_spill] sm:$0xff] %v1308_v39  ;;  %v88_v41 = vadd.f32 %v1308_v39, %v1306_v38  ;;  %v1318_v44 = vld [vmem:[#allocation3 + $0x70] sm:$0xff]  ;;  %v1320_v45 = vld [vmem:[#allocation3 + $0x78] sm:$0xff]  ;;  %v115_v48 = vadd.f32 %v1316_v43, %v1314_v42  ;;  %v279_v55 = vld [vmem:[%s1669_s2 + $0x8] sm:$0xff]  ;;  %v175_v16 = vadd.f32 %v141_v3, %v140_v63 }
  0x1f   :  { %77 = vadd.xlane.f32.xlu0 %v76_v17  ;;  %1700 = vst [vmem:[#allocation18_spill] sm:$0xff] %v1318_v44  ;;  %1701 = vst [vmem:[#allocation19_spill] sm:$0xff] %v1320_v45  ;;  %v91_v49 = vadd.f32 %v1320_v45, %v1318_v44  ;;  %v278_v54 = vld [vmem:[%s1669_s2] sm:$0xff]  ;;  %v280_v60 = vld [vmem:[%s1669_s2 + $0x10] sm:$0xff]  ;;  %v142_v17 = vmul.f32 %v1282_v26, %v1282_v26  ;;  %v148_v51 = vmul.f32 %v1318_v44, %v1318_v44 }
  0x20   :  { %v1032_v58 = vpack.c.bf16 %v279_v55, %v278_v54  ;;  %v281_v61 = vld [vmem:[%s1669_s2 + $0x18] sm:$0xff]  ;;  %v282_v10 = vld [vmem:[%s1669_s2 + $0x20] sm:$0xff]  ;;  %v283_v11 = vld [vmem:[%s1669_s2 + $0x28] sm:$0xff] }
  0x21   :  { %v1035_v7 = vpack.c.bf16 %v281_v61, %v280_v60 }
  0x22   :  { %104 = vadd.xlane.f32.xlu1 %v103_v22  ;;  %1033 = vmatpush3.bf16.msra.mxu0 %v1032_v58  ;;  %v143_v22 = vmul.f32 %v1284_v27, %v1284_v27  ;;  %v1674_v58 = vlaneseq }
  0x23   :  { %80 = vadd.xlane.f32.xlu0 %v79_v23  ;;  %1034 = vmatprep.subr.bf16.mxu0 %v1176_v59  ;;  %v1038_v23 = vpack.c.bf16 %v283_v11, %v282_v10 }
  0x24   :  { %v310_v61 = vand.u32 127, %v1674_v58  ;;  %v1387_v63 = vshrl.u32 %v1674_v58, 7 }
  0x26   :  { %107 = vadd.xlane.f32.xlu1 %v106_v28  ;;  %1036 = vmatpush3.bf16.msra.mxu0 %v1035_v7  ;;  %v284_v28 = vld [vmem:[%s1669_s2 + $0x30] sm:$0xff]  ;;  %1702 = vst [vmem:[#allocation20_spill] sm:$0xff] %v1387_v63  ;;  %v315_v7 = vadd.s32 4294967288, %v310_v61  ;;  %v322_v10 = vadd.s32 4294967280, %v310_v61  ;;  %v329_v11 = vadd.s32 4294967272, %v310_v61 }
  0x27   :  { %83 = vadd.xlane.f32.xlu0 %v82_v29  ;;  %1037 = vmatprep.subr.bf16.mxu0 %v1176_v59  ;;  %v285_v29 = vld [vmem:[%s1669_s2 + $0x38] sm:$0xff] }
  0x2a   :  { %110 = vadd.xlane.f32.xlu1 %v109_v34  ;;  %1039 = vmatpush3.bf16.msra.mxu0 %v1038_v23  ;;  %v178_v34 = vadd.f32 %v143_v22, %v142_v17  ;;  %v343_v22 = vadd.s32 4294967256, %v310_v61  ;;  %v1390_v23 = vsub.s32 %v310_v61, %v1387_v63 }
  0x2b   :  { %86 = vadd.xlane.f32.xlu0 %v85_v35  ;;  %1040 = vmatprep.subr.bf16.mxu0 %v1176_v59  ;;  %v144_v35 = vmul.f32 %v1294_v32, %v1294_v32 }
  0x2e   :  { %113 = vadd.xlane.f32.xlu1 %v112_v40  ;;  %v145_v40 = vmul.f32 %v1296_v33, %v1296_v33 }
  0x2f   :  { %89 = vadd.xlane.f32.xlu0 %v88_v41  ;;  %v1041_v41 = vpack.c.bf16 %v285_v29, %v284_v28  ;;  %v1393_v29 = vsub.s32 %v315_v7, %v1387_v63 }
  0x30   :  { %v181_v46 = vadd.f32 %v145_v40, %v144_v35  ;;  %v350_v35 = vadd.s32 4294967248, %v310_v61 }
  0x31   :  { %1042 = vmatpush3.bf16.msra.mxu0 %v1041_v41  ;;  %v1401_v41 = vsub.s32 %v329_v11, %v1387_v63 }
  0x32   :  { %116 = vadd.xlane.f32.xlu1 %v115_v48  ;;  %v147_v48 = vmul.f32 %v1308_v39, %v1308_v39 }
  0x33   :  { %92 = vadd.xlane.f32.xlu0 %v91_v49  ;;  %v1675_v49 = vmov 0.0  }
  0x34   :  { %1023 = vmatprep.mubr.msk.f32.mxu0 %vm1177_vm0, %v1675_v49  ;;  %1026 = vmatprep.subr.mxu1 %v1675_v49  ;;  %v184_v50 = vadd.f32 %v147_v48, %v146_v47 }
  0x35   :  { %1028 = vmatprep.mubr.msk.f32.mxu1 %vm1177_vm0, %v1675_v49 }
  0x36   :  { %167 = vadd.xlane.f32.xlu1 %v166_v52  ;;  %v149_v52 = vmul.f32 %v1320_v45, %v1320_v45 }
  0x3a   :  { %191 = vadd.xlane.f32.xlu1 %v190_v53  ;;  %v187_v53 = vadd.f32 %v149_v52, %v148_v51 }
  0x3e   :  { %173 = vadd.xlane.f32.xlu1 %v172_v62 }
  0x42   :  { %176 = vadd.xlane.f32.xlu1 %v175_v16  ;;  %v336_v16 = vadd.s32 4294967264, %v310_v61 }
  0x46   :  { %179 = vadd.xlane.f32.xlu1 %v178_v34  ;;  %v1396_v34 = vsub.s32 %v322_v10, %v1387_v63 }
  0x4a   :  { %182 = vadd.xlane.f32.xlu1 %v181_v46  ;;  %v1404_v46 = vsub.s32 %v336_v16, %v1387_v63 }
  0x4e   :  { %185 = vadd.xlane.f32.xlu1 %v184_v50  ;;  %v1411_v50 = vsub.s32 %v343_v22, %v1387_v63 }
  0x52   :  { %188 = vadd.xlane.f32.xlu1 %v187_v53 }
  0xa3   :  { %v96_v54 = vpop.xlane.xlu1 %95 }
  0xa4   :  { %v72_v55 = vpop.xlane.xlu0 %71  ;;  %v126_v52 = vmul.f32 0.00390625, %v96_v54 }
  0xa5   :  { %v118_v10 = vmul.f32 0.00390625, %v72_v55 }
  0xa7   :  { %v99_v56 = vpop.xlane.xlu1 %98  ;;  %v314_v49 = vrot.slane %v118_v10, %v1390_v23 }
  0xa8   :  { %v75_v57 = vpop.xlane.xlu0 %74  ;;  %v1398_v40 = vmul.f32 0.00390625, %v99_v56 }
  0xa9   :  { %v1406_v47 = vmul.f32 0.00390625, %v75_v57  ;;  %v1422_v57 = vsub.s32 %v350_v35, %v1387_v63  ;;  %v367_v35 = vrot.slane %v126_v52, %v1390_v23 }
  0xab   :  { %v102_v59 = vpop.xlane.xlu1 %101 }
  0xac   :  { %v78_v60 = vpop.xlane.xlu0 %77  ;;  %v1408_v48 = vmul.f32 0.00390625, %v102_v59  ;;  %v371_v59 = vrot.slane %v1398_v40, %v1393_v29 }
  0xad   :  { %v1413_v53 = vmul.f32 0.00390625, %v78_v60  ;;  %v357_v60 = vadd.s32 4294967240, %v310_v61 }
  0xae   :  { %v376_v55 = vrot.slane %v1408_v48, %v1396_v34  ;;  %v372_v45 = vsel %vm320_vm1, %v371_v59, %v367_v35 }
  0xaf   :  { %v105_v62 = vpop.xlane.xlu1 %104  ;;  %v326_v58 = vrot.slane %v1413_v53, %v1396_v34  ;;  %v1456_v32 = vsub.s32 %v357_v60, %v1387_v63 }
  0xb0   :  { %v81_v3 = vpop.xlane.xlu0 %80  ;;  %v1415_v56 = vmul.f32 0.00390625, %v105_v62  ;;  %v319_v62 = vrot.slane %v1406_v47, %v1393_v29  ;;  %v377_v33 = vsel %vm327_vm2, %v376_v55, %v372_v45 }
  0xb1   :  { %v1417_v11 = vmul.f32 0.00390625, %v81_v3 }
  0xb2   :  { %v321_v26 = vsel %vm320_vm1, %v319_v62, %v314_v49 }
  0xb3   :  { %v108_v17 = vpop.xlane.xlu1 %107  ;;  %v333_v44 = vrot.slane %v1417_v11, %v1401_v41  ;;  %v328_v35 = vsel %vm327_vm2, %v326_v58, %v321_v26 }
  0xb4   :  { %v84_v28 = vpop.xlane.xlu0 %83  ;;  %v1419_v16 = vmul.f32 0.00390625, %v108_v17 }
  0xb5   :  { %v1426_v22 = vmul.f32 0.00390625, %v84_v28  ;;  %v381_v28 = vrot.slane %v1415_v56, %v1401_v41  ;;  %v335_v49 = vsel %vm334_vm3, %v333_v44, %v328_v35 }
  0xb7   :  { %v111_v51 = vpop.xlane.xlu1 %110  ;;  %v340_v39 = vrot.slane %v1426_v22, %v1404_v46  ;;  %v382_v20 = vsel %vm334_vm3, %v381_v28, %v377_v33 }
  0xb8   :  { %v87_v7 = vpop.xlane.xlu0 %86  ;;  %v1428_v54 = vmul.f32 0.00390625, %v111_v51 }
  0xb9   :  { %v1434_v3 = vmul.f32 0.00390625, %v87_v7  ;;  %v386_v7 = vrot.slane %v1419_v16, %v1404_v46  ;;  %v342_v55 = vsel %vm341_vm4, %v340_v39, %v335_v49 }
  0xbb   :  { %v114_v17 = vpop.xlane.xlu1 %113  ;;  %v347_v27 = vrot.slane %v1434_v3, %v1411_v50  ;;  %v387_v45 = vsel %vm341_vm4, %v386_v7, %v382_v20  ;;  %v230_v20 = vmul.f32 %v118_v10, %v118_v10 }
  0xbc   :  { %v1441_v51 = vmul.f32 0.00390625, %v114_v17  ;;  %v90_v61 = vpop.xlane.xlu0 %89  ;;  %v391_v17 = vrot.slane %v1428_v54, %v1411_v50 }
  0xbd   :  { %v1448_v38 = vmul.f32 0.00390625, %v90_v61  ;;  %v349_v33 = vsel %vm348_vm5, %v347_v27, %v342_v55  ;;  %v238_v27 = vmul.f32 %v126_v52, %v126_v52 }
  0xbe   :  { %v396_v61 = vrot.slane %v1441_v51, %v1422_v57  ;;  %v392_v21 = vsel %vm348_vm5, %v391_v17, %v387_v45  ;;  %v1704_v45 = vmov 0.0  }
  0xbf   :  { %v117_v59 = vpop.xlane.xlu1 %116  ;;  %v354_v14 = vrot.slane %v1448_v38, %v1422_v57 }
  0xc0   :  { %v1468_v60 = vmul.f32 0.00390625, %v117_v59  ;;  %v93_v63 = vpop.xlane.xlu0 %92  ;;  %v397_v58 = vsel %vm355_vm6, %v396_v61, %v392_v21 }
  0xc1   :  { %v1472_v62 = vmul.f32 0.00390625, %v93_v63  ;;  %v356_v63 = vsel %vm355_vm6, %v354_v14, %v349_v33 }
  0xc2   :  { %v401_v26 = vrot.slane %v1468_v60, %v1456_v32 }
  0xc3   :  { %v361_v44 = vrot.slane %v1472_v62, %v1456_v32  ;;  %v168_v28 = vpop.xlane.xlu1 %167 }
  0xc4   :  { %v214_v7 = vmul.f32 0.00390625, %v168_v28  ;;  %v402_v39 = vsel %vm362_vm7, %v401_v26, %v397_v58  ;;  %v479_v28 = vld [vmem:[%s1671_s4] sm:$0xf] }
  0xc5   :  { %v363_v17 = vsel %vm362_vm7, %v361_v44, %v356_v63  ;;  %1027 = vmatpush3.msk.msra.mxu1 %vm491_vm10, %v479_v28 }
  0xc6   :  { %v246_v59 = vsub.f32 %v214_v7, %v230_v20  ;;  %v1486_v35 = vsel %vm403_vm8, %v402_v39, %v363_v17  ;;  %v988_v20 = vld [vmem:[%s1670_s3] ss:$0 sm:$0xff] }
  0xc7   :  { %1703 = vst [vmem:[#allocation21_spill] sm:$0xff] %v1486_v35  ;;  %1024 = vmatmul.mubr.msk.f32.vlgmr.msra.gmra.mrb[0].mxu0 %vm405_vm9, %v1486_v35  ;;  %v192_v21 = vpop.xlane.xlu1 %191 }
  0xc8   :  { %v262_v61 = vmax.f32 %v246_v59, 0.0  ;;  %v222_v49 = vmul.f32 0.00390625, %v192_v21  ;;  %909 = vmatprep.mubr.f32.mxu0 %v1704_v45  ;;  %v990_v59 = vld [vmem:[%s1672_s5] ss:$0 sm:$0xff] }
  0xca   :  { %v577_v10 = vadd.f32 1e-05, %v262_v61  ;;  %v254_v14 = vsub.f32 %v222_v49, %v238_v27  ;;  %v136_v27 = vmul.f32 %v1246_v8, %v1246_v8  ;;  %v137_v61 = vmul.f32 %v1248_v9, %v1248_v9 }
  0xcc   :  { %1085 = vrsqrt.f32 %v577_v10  ;;  %v270_v55 = vmax.f32 %v254_v14, 0.0 }
  0xce   :  { %v585_v26 = vadd.f32 1e-05, %v270_v55  ;;  %v169_v55 = vadd.f32 %v137_v61, %v136_v27  ;;  %v159_v27 = vmul.f32 %v1280_v25, %v1280_v25 }
  0xd0   :  { %1087 = vrsqrt.f32 %v585_v26  ;;  %v153_v26 = vmul.f32 %v1242_v6, %v1242_v6 }
  0xd6   :  { %v1491_v33 = vpop.eup %1085 }
  0xda   :  { %v1495_v44 = vpop.eup %1087 }
 0x19a   :  { %v474_v63 = vpop.f32.mrb[0].mxu0 }
 0x19b   :  { %v475_v7 = vadd.f32 %v988_v20, %v474_v63  ;;  %v1025_v39 = vpop.f32.mrb[1].mxu0  ;;  %v154_v20 = vmul.f32 %v1254_v12, %v1254_v12  ;;  %v155_v63 = vmul.f32 %v1256_v13, %v1256_v13 }
 0x19c   :  { %v156_v39 = vmul.f32 %v1266_v18, %v1266_v18 }
 0x19d   :  { %v478_v17 = vmax.f32 %v475_v7, 0.0  ;;  %v196_v7 = vadd.f32 %v155_v63, %v154_v20  ;;  %v164_v20 = vmul.f32 %v1314_v42, %v1314_v42  ;;  %v165_v63 = vmul.f32 %v1316_v43, %v1316_v43 }
 0x19f   :  { %1029 = vmatmul.mubr.msk.f32.vlgmr.msra.gmra.mrb[0].mxu1 %vm487_vm11, %v478_v17  ;;  %v157_v17 = vmul.f32 %v1268_v19, %v1268_v19 }
 0x1a0   :  { %795 = vmatprep.mubr.f32.mxu1 %v1704_v45  ;;  %v152_v45 = vmul.f32 %v1240_v5, %v1240_v5 }
 0x1a2   :  { %v193_v28 = vadd.f32 %v153_v26, %v152_v45  ;;  %v162_v45 = vmul.f32 %v1302_v36, %v1302_v36  ;;  %v163_v26 = vmul.f32 %v1304_v37, %v1304_v37 }
 0x272   :  { %v561_v21 = vpop.f32.mrb[0].mxu1 }
 0x273   :  { %v562_v49 = vadd.f32 %v990_v59, %v561_v21  ;;  %v1030_v10 = vpop.f32.mrb[1].mxu1  ;;  %v199_v59 = vadd.f32 %v157_v17, %v156_v39  ;;  %v158_v21 = vmul.f32 %v1278_v24, %v1278_v24  ;;  %v1043_v39 = vpack.c.bf16 %v1248_v9, %v1238_v4  ;;  %v174_v17 = vpop.xlane.xlu1 %173 }
 0x274   :  { %v160_v10 = vmul.f32 %v1290_v30, %v1290_v30  ;;  %v234_v4 = vmul.f32 %v1426_v22, %v1426_v22  ;;  %v231_v22 = vmul.f32 %v1406_v47, %v1406_v47 }
 0x275   :  { %v566_v14 = vsel %vm565_vm12, %v562_v49, -inf  ;;  %v202_v61 = vadd.f32 %v159_v27, %v158_v21  ;;  %1044 = vmatprep.subr.bf16.mxu1 %v1043_v39 }
 0x276   :  { %567 = vmax.xlane.f32.xlu0 %v566_v14  ;;  %v161_v14 = vmul.f32 %v1292_v31, %v1292_v31 }
 0x27a   :  { %170 = vadd.xlane.f32.xlu0 %v169_v55  ;;  %v205_v55 = vadd.f32 %v161_v14, %v160_v10  ;;  %v232_v14 = vmul.f32 %v1413_v53, %v1413_v53  ;;  %v236_v53 = vmul.f32 %v1448_v38, %v1448_v38 }
 0x27e   :  { %194 = vadd.xlane.f32.xlu0 %v193_v28  ;;  %v208_v28 = vadd.f32 %v163_v26, %v162_v45  ;;  %v233_v45 = vmul.f32 %v1417_v11, %v1417_v11 }
 0x282   :  { %197 = vadd.xlane.f32.xlu0 %v196_v7  ;;  %v211_v7 = vadd.f32 %v165_v63, %v164_v20 }
 0x286   :  { %200 = vadd.xlane.f32.xlu0 %v199_v59  ;;  %v177_v59 = vpop.xlane.xlu1 %176 }
 0x28a   :  { %203 = vadd.xlane.f32.xlu0 %v202_v61  ;;  %v180_v21 = vpop.xlane.xlu1 %179  ;;  %v216_v61 = vmul.f32 0.00390625, %v174_v17  ;;  %v235_v17 = vmul.f32 %v1434_v3, %v1434_v3 }
 0x28c   :  { %v248_v26 = vsub.f32 %v216_v61, %v232_v14 }
 0x28e   :  { %206 = vadd.xlane.f32.xlu0 %v205_v55  ;;  %v183_v27 = vpop.xlane.xlu1 %182  ;;  %v217_v55 = vmul.f32 0.00390625, %v177_v59  ;;  %v264_v59 = vmax.f32 %v248_v26, 0.0 }
 0x28f   :  { %v219_v20 = vmul.f32 0.00390625, %v183_v27 }
 0x290   :  { %v249_v9 = vsub.f32 %v217_v55, %v233_v45 }
 0x291   :  { %v251_v11 = vsub.f32 %v219_v20, %v235_v17 }
 0x292   :  { %209 = vadd.xlane.f32.xlu0 %v208_v28  ;;  %v186_v10 = vpop.xlane.xlu1 %185  ;;  %v218_v28 = vmul.f32 0.00390625, %v180_v21  ;;  %v265_v27 = vmax.f32 %v249_v9, 0.0 }
 0x293   :  { %v220_v63 = vmul.f32 0.00390625, %v186_v10  ;;  %v237_v10 = vmul.f32 %v1472_v62, %v1472_v62  ;;  %v267_v45 = vmax.f32 %v251_v11, 0.0 }
 0x294   :  { %v250_v58 = vsub.f32 %v218_v28, %v234_v4  ;;  %v580_v28 = vadd.f32 1e-05, %v265_v27 }
 0x295   :  { %v252_v14 = vsub.f32 %v220_v63, %v236_v53  ;;  %v240_v53 = vmul.f32 %v1408_v48, %v1408_v48 }
 0x296   :  { %212 = vadd.xlane.f32.xlu0 %v211_v7  ;;  %v189_v7 = vpop.xlane.xlu1 %188  ;;  %v266_v55 = vmax.f32 %v250_v58, 0.0 }
 0x297   :  { %v221_v61 = vmul.f32 0.00390625, %v189_v7  ;;  %v268_v20 = vmax.f32 %v252_v14, 0.0  ;;  %v582_v7 = vadd.f32 1e-05, %v267_v45 }
 0x298   :  { %v581_v47 = vadd.f32 1e-05, %v266_v55 }
 0x299   :  { %v253_v38 = vsub.f32 %v221_v61, %v237_v10  ;;  %v241_v10 = vmul.f32 %v1415_v56, %v1415_v56 }
 0x303   :  { %v568_v39 = vpop.xlane.xlu0 %567 }
 0x304   :  { %v569_v52 = vsub.f32 %v562_v49, %v568_v39  ;;  %v579_v49 = vadd.f32 1e-05, %v264_v59  ;;  %v269_v39 = vmax.f32 %v253_v38, 0.0 }
 0x306   :  { %v570_v21 = vmul.f32 1.442695, %v569_v52  ;;  %v239_v52 = vmul.f32 %v1398_v40, %v1398_v40  ;;  %v584_v40 = vadd.f32 1e-05, %v269_v39 }
 0x307   :  { %v171_v35 = vpop.xlane.xlu0 %170 }
 0x308   :  { %1089 = vpow2.f32 %v570_v21  ;;  %v215_v3 = vmul.f32 0.00390625, %v171_v35  ;;  %v583_v35 = vadd.f32 1e-05, %v268_v20 }
 0x309   :  { %1091 = vrsqrt.f32 %v579_v49 }
 0x30a   :  { %v247_v26 = vsub.f32 %v215_v3, %v231_v22  ;;  %1093 = vrsqrt.f32 %v580_v28 }
 0x30b   :  { %v195_v4 = vpop.xlane.xlu0 %194 }
 0x30c   :  { %v263_v9 = vmax.f32 %v247_v26, 0.0  ;;  %v223_v63 = vmul.f32 0.00390625, %v195_v4  ;;  %v242_v26 = vmul.f32 %v1419_v16, %v1419_v16 }
 0x30e   :  { %v578_v62 = vadd.f32 1e-05, %v263_v9  ;;  %v255_v17 = vsub.f32 %v223_v63, %v239_v52 }
 0x30f   :  { %v198_v58 = vpop.xlane.xlu0 %197 }
 0x310   :  { %1095 = vrsqrt.f32 %v578_v62  ;;  %v271_v59 = vmax.f32 %v255_v17, 0.0  ;;  %v224_v11 = vmul.f32 0.00390625, %v198_v58 }
 0x311   :  { %1097 = vrsqrt.f32 %v581_v47  ;;  %v243_v47 = vmul.f32 %v1428_v54, %v1428_v54 }
 0x312   :  { %v1562_v61 = vpop.eup %1089  ;;  %1099 = vrsqrt.f32 %v582_v7  ;;  %v586_v21 = vadd.f32 1e-05, %v271_v59  ;;  %v256_v27 = vsub.f32 %v224_v11, %v240_v53  ;;  %v244_v53 = vmul.f32 %v1441_v51, %v1441_v51 }
 0x313   :  { %1101 = vrsqrt.f32 %v583_v35  ;;  %v201_v14 = vpop.xlane.xlu0 %200  ;;  %v572_v22 = vsel %vm565_vm12, %v1562_v61, 0.0  ;;  %v1092_v45 = vpop.eup %1091  ;;  %v1705_v11 = vrot.slane %v1491_v33, %v1390_v23 }
 0x314   :  { %1103 = vrsqrt.f32 %v586_v21  ;;  %v272_v48 = vmax.f32 %v256_v27, 0.0  ;;  %v225_v3 = vmul.f32 0.00390625, %v201_v14  ;;  %573 = vadd.xlane.f32.xlu1 %v572_v22  ;;  %v1094_v4 = vpop.eup %1093  ;;  %v637_v17 = vrot.slane %v1092_v45, %v1396_v34 }
 0x315   :  { %1105 = vrsqrt.f32 %v584_v40  ;;  %v642_v59 = vrot.slane %v1094_v4, %v1401_v41  ;;  %v245_v21 = vmul.f32 %v1468_v60, %v1468_v60  ;;  %v1045_v60 = vpack.c.bf16 %v1246_v8, %v1234_v2 }
 0x316   :  { %v587_v49 = vadd.f32 1e-05, %v272_v48  ;;  %v257_v55 = vsub.f32 %v225_v3, %v241_v10 }
 0x317   :  { %v204_v38 = vpop.xlane.xlu0 %203  ;;  %1046 = vmatpush1.bf16.msra.mxu1 %v1045_v60 }
 0x318   :  { %1107 = vrsqrt.f32 %v587_v49  ;;  %v273_v28 = vmax.f32 %v257_v55, 0.0  ;;  %v226_v20 = vmul.f32 0.00390625, %v204_v38 }
 0x31a   :  { %v1096_v52 = vpop.eup %1095  ;;  %v588_v9 = vadd.f32 1e-05, %v273_v28  ;;  %v258_v63 = vsub.f32 %v226_v20, %v242_v26  ;;  %v1706_v26 = vrot.slane %v1495_v44, %v1390_v23  ;;  %v1059_v20 = vpack.c.bf16 %v1242_v6, %v1232_v1 }
 0x31b   :  { %v1098_v56 = vpop.eup %1097  ;;  %v632_v7 = vrot.slane %v1096_v52, %v1393_v29  ;;  %v207_v39 = vpop.xlane.xlu0 %206 }
 0x31c   :  { %v1100_v62 = vpop.eup %1099  ;;  %1109 = vrsqrt.f32 %v588_v9  ;;  %v274_v35 = vmax.f32 %v258_v63, 0.0  ;;  %v227_v16 = vmul.f32 0.00390625, %v207_v39  ;;  %v647_v10 = vrot.slane %v1098_v56, %v1404_v46  ;;  %1060 = vmatprep.subr.bf16.mxu0 %v1059_v20  ;;  %v1707_v56 = vld [vmem:[#allocation11_spill] sm:$0xff]  ;;  %v1708_v39 = vld [vmem:[#allocation9_spill] sm:$0xff] }
 0x31d   :  { %v1102_v58 = vpop.eup %1101  ;;  %v633_v54 = vsel %vm320_vm1, %v632_v7, %v1705_v11  ;;  %v652_v48 = vrot.slane %v1100_v62, %v1411_v50  ;;  %v1061_v63 = vpack.c.bf16 %v1240_v5, %v1230_v0  ;;  %v1047_v1 = vpack.c.bf16 %v1707_v56, %v1260_v15  ;;  %v1709_v62 = vld [vmem:[#allocation10_spill] sm:$0xff]  ;;  %v1711_v11 = vld [vmem:[#allocation15_spill] sm:$0xff] }
 0x31e   :  { %v1104_v40 = vpop.eup %1103  ;;  %v638_v27 = vsel %vm327_vm2, %v637_v17, %v633_v54  ;;  %v589_v14 = vadd.f32 1e-05, %v274_v35  ;;  %v259_v22 = vsub.f32 %v227_v16, %v243_v47  ;;  %v657_v38 = vrot.slane %v1102_v58, %v1422_v57 }
 0x31f   :  { %v643_v51 = vsel %vm334_vm3, %v642_v59, %v638_v27  ;;  %v671_v3 = vrot.slane %v1104_v40, %v1393_v29  ;;  %v210_v49 = vpop.xlane.xlu0 %209  ;;  %v1106_v33 = vpop.eup %1105  ;;  %1062 = vmatpush1.bf16.msra.mxu0 %v1061_v63  ;;  %v1049_v0 = vpack.c.bf16 %v1709_v62, %v1708_v39  ;;  %1048 = vmatprep.subr.bf16.mxu1 %v1047_v1  ;;  %v1710_v59 = vld [vmem:[#allocation13_spill] sm:$0xff]  ;;  %v1712_v27 = vld [vmem:[#allocation12_spill] sm:$0xff]  ;;  %v1180_v1 = vmov 269488144  }
 0x320   :  { %1111 = vrsqrt.f32 %v589_v14  ;;  %v275_v55 = vmax.f32 %v259_v22, 0.0  ;;  %v228_v45 = vmul.f32 0.00390625, %v210_v49  ;;  %v648_v29 = vsel %vm341_vm4, %v647_v10, %v643_v51  ;;  %v1714_v10 = vld [vmem:[#allocation17_spill] sm:$0xff]  ;;  %v1717_v49 = vld [vmem:[#allocation18_spill] sm:$0xff] }
 0x321   :  { %v672_v28 = vsel %vm320_vm1, %v671_v3, %v1706_v26  ;;  %v653_v2 = vsel %vm348_vm5, %v652_v48, %v648_v29  ;;  %v662_v8 = vrot.slane %v1106_v33, %v1456_v32  ;;  %1050 = vmatpush1.bf16.msra.mxu1 %v1049_v0  ;;  %v1065_v58 = vpack.c.bf16 %v1266_v18, %v1254_v12  ;;  %v1715_v48 = vld [vmem:[#allocation19_spill] sm:$0xff]  ;;  %v1716_v3 = vld [vmem:[#allocation16_spill] sm:$0xff] }
 0x322   :  { %v1108_v4 = vpop.eup %1107  ;;  %v590_v52 = vadd.f32 1e-05, %v275_v55  ;;  %v260_v9 = vsub.f32 %v228_v45, %v244_v53  ;;  %v658_v6 = vsel %vm355_vm6, %v657_v38, %v653_v2  ;;  %v1051_v54 = vpack.c.bf16 %v1711_v11, %v1710_v59 }
 0x323   :  { %v676_v23 = vrot.slane %v1108_v4, %v1396_v34  ;;  %v213_v44 = vpop.xlane.xlu0 %212  ;;  %v1063_v34 = vpack.c.bf16 %v1268_v19, %v1256_v13  ;;  %v663_v17 = vsel %vm362_vm7, %v662_v8, %v658_v6  ;;  %v1713_v13 = vld [vmem:[#allocation14_spill] sm:$0xff]  ;;  %v1069_v18 = vpack.c.bf16 %v1290_v30, %v1278_v24  ;;  %v1718_v4 = vld [vmem:[#allocation21_spill] sm:$0xff]  ;;  %v1719_v8 = vld [vmem:[#allocation20_spill] sm:$0xff] }
 0x324   :  { %1113 = vrsqrt.f32 %v590_v52  ;;  %v276_v47 = vmax.f32 %v260_v9, 0.0  ;;  %v229_v7 = vmul.f32 0.00390625, %v213_v44  ;;  %v1053_v19 = vpack.c.bf16 %v1713_v13, %v1712_v27  ;;  %1052 = vmatprep.subr.bf16.mxu1 %v1051_v54 }
 0x325   :  { %v677_v5 = vsel %vm327_vm2, %v676_v23, %v672_v28  ;;  %1064 = vmatprep.subr.bf16.mxu0 %v1063_v34  ;;  %v1055_v51 = vpack.c.bf16 %v1715_v48, %v1714_v10  ;;  %v1057_v33 = vpack.c.bf16 %v1717_v49, %v1716_v3  ;;  %v1073_v24 = vpack.c.bf16 %v1314_v42, %v1302_v36 }
 0x326   :  { %v1110_v35 = vpop.eup %1109  ;;  %v591_v16 = vadd.f32 1e-05, %v276_v47  ;;  %v261_v15 = vsub.f32 %v229_v7, %v245_v21  ;;  %1066 = vmatpush1.bf16.msra.mxu0 %v1065_v58  ;;  %v1067_v21 = vpack.c.bf16 %v1292_v31, %v1280_v25  ;;  %1054 = vmatpush1.bf16.msra.mxu1 %v1053_v19  ;;  %v1071_v25 = vpack.c.bf16 %v1316_v43, %v1304_v37 }
 0x327   :  { %v681_v53 = vrot.slane %v1110_v35, %v1401_v41  ;;  %1056 = vmatprep.subr.bf16.mxu1 %v1055_v51  ;;  %v939_v6 = vunpack.c.l.s4 %v1180_v1  ;;  %v950_v7 = vsub.s32 0, %v1719_v8  ;;  %v954_v0 = vsub.s32 1, %v1719_v8  ;;  %v711_v35 = vld [vmem:[%s1668_s1] sm:$0x3]  ;;  %s1182_s1 = smov [#allocation6]  }
 0x328   :  { %1115 = vrsqrt.f32 %v591_v16  ;;  %v277_v40 = vmax.f32 %v261_v15, 0.0  ;;  %1068 = vmatprep.subr.bf16.mxu0 %v1067_v21  ;;  %s979_s5 = sshll.u32 %s1182_s1, 4  ;;  %s980_s5 = int_to_ptr.vmem [resolvable:$true] %s979_s5 }
 0x329   :  { %v682_v14 = vsel %vm334_vm3, %v681_v53, %v677_v5  ;;  %v1181_v5 = vmov 1983009808   ;;  %v940_v58 = vunpack.c.0.s8 %v939_v6  ;;  %v951_v59 = vrot.slane %v711_v35, %v950_v7  ;;  %s1147_s7 = scalar_lea.vmem %s980_s5, 64  ;;  %p1152_p9 = scmp.lt.s32.totalorder %s980_s5, %s980_s5 }
 0x32a   :  { %v1112_v22 = vpop.eup %1111  ;;  %v592_v12 = vadd.f32 1e-05, %v277_v40  ;;  %1070 = vmatpush1.bf16.msra.mxu0 %v1069_v18  ;;  %1058 = vmatpush1.bf16.msra.mxu1 %v1057_v33  ;;  %v958_v34 = vunpack.c.l.s4 %v1181_v5  ;;  %v955_v11 = vrot.slane %v711_v35, %v954_v0  ;;  %p1148_p8 = scmp.ne.s32.totalorder %s980_s5, %s1147_s7  ;;  %p1153_p10 = scmp.lt.s32.totalorder %s1147_s7, %s1147_s7 }
 0x32b   :  { %v686_v41 = vrot.slane %v1112_v22, %v1404_v46  ;;  %1072 = vmatprep.subr.bf16.mxu0 %v1071_v25  ;;  %v943_v40 = vsub.s32 %v940_v58, %v1719_v8 }
 0x32c   :  { %1117 = vrsqrt.f32 %v592_v12  ;;  %v959_v54 = vunpack.c.0.s8 %v958_v34  ;;  %v956_v27 = vcombine.low %v951_v59, %v955_v11  ;;  %p1154_p11 = por %p1153_p10, %p1152_p9 }
 0x32d   :  { %v687_v55 = vsel %vm341_vm4, %v686_v41, %v682_v14 }
 0x32e   :  { %v1114_v30 = vpop.eup %1113  ;;  %1074 = vmatpush1.bf16.msra.mxu0 %v1073_v24  ;;  %v962_v13 = vsub.s32 %v959_v54, %v1719_v8  ;;  %p1155_p12 = pnand %p1154_p11, %p1148_p8 }
 0x32f   :  { %v691_v31 = vrot.slane %v1114_v30, %v1411_v50 }
 0x330   :  { %v963_v21 = vrot.slane %v956_v27, %v962_v13 }
 0x331   :  { %v692_v46 = vsel %vm348_vm5, %v691_v31, %v687_v55 }
 0x332   :  { %v1116_v45 = vpop.eup %1115 }
 0x333   :  { %v696_v60 = vrot.slane %v1116_v45, %v1422_v57 }
 0x335   :  { %v697_v38 = vsel %vm355_vm6, %v696_v60, %v692_v46 }
 0x336   :  { %v1118_v26 = vpop.eup %1117 }
 0x337   :  { %v701_v28 = vrot.slane %v1118_v26, %v1456_v32  ;;  %v1179_v32 = vmov 1966171168  }
 0x338   :  { %v806_v9 = vunpack.c.l.s4 %v1179_v32 }
 0x339   :  { %v702_v37 = vsel %vm362_vm7, %v701_v28, %v697_v38 }
 0x33a   :  { %v703_v36 = vsel %vm403_vm8, %v702_v37, %v663_v17  ;;  %v807_v63 = vunpack.c.0.s8 %v806_v9  ;;  %v1720_v17 = vlaneseq }
 0x33c   :  { %v810_v23 = vsub.s32 %v807_v63, %v1719_v8  ;;  %vm822_vm13 = vcmp.lt.s32.totalorder %v1720_v17, 256 }
 0x3a1   :  { %v574_v42 = vpop.xlane.xlu1 %573 }
 0x3a2   :  { %1119 = vrcp.f32 %v574_v42 }
 0x3ac   :  { %v1120_v43 = vpop.eup %1119 }
 0x3ad   :  { %v576_v50 = vmul.f32 %v1120_v43, %v1562_v61 }
 0x3af   :  { %v705_v20 = vmul.f32 %v703_v36, %v576_v50 }
 0x3b1   :  { %993 = vmatmul.mubr.msk.f32.vlgmr.msra.gmra.mrb[2].mxu1 %vm405_vm9, %v705_v20  ;;  %v842_v29 = vrot.slane %v705_v20, 1  ;;  %v707_v57 = vmul.f32 %v705_v20, %v1718_v4 }
 0x3b3   :  { %994 = vmatmul.mubr.msk.f32.vlgmr.msra.gmra.mrb[2].mxu0 %vm405_vm9, %v842_v29  ;;  %v708_v52 = vsel %vm565_vm12, %v707_v57, 0.0 }
 0x3b4   :  { %709 = vadd.xlane.f32.xlu0 %v708_v52 }
 0x441   :  { %v710_v19 = vpop.xlane.xlu0 %709 }
 0x442   :  { %v944_v14 = vrot.slane %v710_v19, %v943_v40 }
 0x484   :  { %v797_v2 = vpop.f32.mrb[2].mxu1 }
 0x485   :  { %v799_v44 = vpop.f32.mrb[3].mxu1 }
 0x486   :  { %v804_v56 = vcombine.low %v797_v2, %v799_v44  ;;  %v911_v61 = vpop.f32.mrb[2].mxu0 }
 0x487   :  { %v913_v47 = vpop.f32.mrb[3].mxu0 }
 0x488   :  { %v811_v39 = vrot.slane %v804_v56, %v810_v23  ;;  %v918_v62 = vcombine.low %v911_v61, %v913_v47 }
 0x48a   :  { %v818_v16 = vrot.slane %v811_v39, %v810_v23  ;;  %v925_v15 = vrot.slane %v918_v62, %v810_v23 }
 0x48c   :  { %824 = vst.msk [vmem:[#allocation2] ss:$2 sm:$0x3] %vm822_vm13, %v818_v16  ;;  %v932_v53 = vrot.slane %v925_v15, %v810_v23 }
 0x48e   :  { %935 = vst.msk [vmem:[#allocation2 + $0x1] ss:$2 sm:$0x3] %vm822_vm13, %v932_v53 }
 0x495   :  { %v936_v22 = vld [vmem:[#allocation2] sm:$0xf] }
 0x496   :  { %v946_v12 = vsub.f32 %v936_v22, %v944_v14 }
 0x498   :  { %v965_v18 = vmul.f32 %v963_v21, %v946_v12 }
 0x49a   :  { %v995_v41 = vmul.f32 -1.442695, %v965_v18 }
 0x49c   :  { %1121 = vpow2.f32 %v995_v41 }
 0x4a6   :  { %v1122_v10 = vpop.eup %1121 }
 0x4a7   :  { %v969_v48 = vadd.f32 1.0, %v1122_v10 }
 0x4a9   :  { %1123 = vrcp.f32 %v969_v48 }
 0x4b3   :  { %v1124_v51 = vpop.eup %1123 }
 0x4b4   :  { %972 = vst [vmem:[#allocation6] sm:$0xf] %v1124_v51 }
 0x4b5   :  { %1158 = shalt.err (!%p1155_p12)
}
 0x4b6   :  { %s1159_s10 = scalar_lea.hbm %s1673_s6, 64 }
 0x4b7   :  { %p1160_p13 = scmp.ne.s32.totalorder %s1673_s6, %s1159_s10  ;;  %p1163_p0 = scmp.lt.u32.totalorder %s1159_s10, %s1673_s6 }
 0x4b9   :  { %p1165_p1 = pnand %p1163_p0, %p1160_p13 }
 0x4bb   :  { %1168 = shalt.err (!%p1165_p1)
}
 0x4bc   :  { %982 = dma.vmem_to_hbm [thread:$0]  %s980_s5, 64, %s1673_s6, [#allocation5]  }
 0x4bd   :  { %1171 = dma.done.wait [#allocation5], 64  }
 0x4be   :  { %1172 = vsyncadd [#allocation5], 4294967232 }
 0x4bf   :  { %986 = vsyncpa [#allocation4], 1 }
 0x4c0   :  { %987 = vsyncpa [#allocation5], 1 }

</bundles_post_ra>
